<compile_context>
chip_gen: v5e
topology: v5e:2x2
jax: 0.10.0
libtpu: 0.0.40
codegen_flags: <defaults>
</compile_context>

<pallas_src>
import functools

import jax
import jax.numpy as jnp
from jax.experimental import pallas as pl
from jax.experimental.pallas import tpu as pltpu

EPS = 1e-5
MXU_DTYPE = jnp.float32   # flip to jnp.bfloat16 on v6e/v7x if the accuracy budget allows


# ------------------------------ Pallas kernel -------------------------------

def fused_block_kernel(ax_ref, w13_ref, b13_ref, w2_ref, b2_ref, o_ref, h1p_ref,
                       *, Ho, Wo, Cin, Cout):
    """Whole residual block for one sample per grid step, entirely in VMEM.

    ax_ref : [4, Hp, Wp, 2*Cin]  even/odd H x W phase planes of the zero-padded
             concat([BN1+ReLU(x), x], axis=-1) for this sample.
    w13_ref: [3, 3, 2*Cin, 2*Cout]  block-diagonal (w1*BN2scale | w3*BN3scale).
    b13_ref: [1, 2*Cout]            concat(folded conv1+BN2 bias, folded conv3+BN3 bias).
    w2_ref : [3, 3, Cout, Cout],  b2_ref: [1, Cout].
    h1p_ref: VMEM scratch [Ho+2, Wo+2, Cout]  (zero halo for the stride-1 conv2).
    """
    M = Ho * Wo

    # ---- stage A: conv1(3x3,s2)+BN2  and  skip conv3(3x3,s2)+BN3, one matmul per tap ----
    planes = [ax_ref[i] for i in range(4)]                 # hoisted: each [Hp, Wp, 2*Cin]
    acc13 = jnp.zeros((M, 2 * Cout), jnp.float32)
    for kh in range(3):
        for kw in range(3):
            p = 2 * (kh % 2) + (kw % 2)                    # phase plane of this tap
            oh, ow = kh // 2, kw // 2                      # window offset inside the plane
            lhs = planes[p][oh:oh + Ho, ow:ow + Wo, :].reshape(M, 2 * Cin)
            acc13 = acc13 + jnp.dot(lhs.astype(MXU_DTYPE),
                                    w13_ref[kh, kw].astype(MXU_DTYPE),
                                    preferred_element_type=jnp.float32)
    res = acc13 + b13_ref[...]
    h1 = jnp.maximum(res[:, :Cout], 0.0)                   # conv1 + BN2 + ReLU
    skip = res[:, Cout:]                                   # conv3 + BN3

    # ---- stage B: conv2(3x3,s1) over h1 (VMEM zero halo) + bias + residual skip add ----
    h1p_ref[...] = jnp.zeros_like(h1p_ref)
    h1p_ref[1:Ho + 1, 1:Wo + 1, :] = h1.reshape(Ho, Wo, Cout)
    h1w = h1p_ref[...]
    acc2 = jnp.zeros((M, Cout), jnp.float32)
    for kh in range(3):
        for kw in range(3):
            lhs = h1w[kh:kh + Ho, kw:kw + Wo, :].reshape(M, Cout)
            acc2 = acc2 + jnp.dot(lhs.astype(MXU_DTYPE),
                                  w2_ref[kh, kw].astype(MXU_DTYPE),
                                  preferred_element_type=jnp.float32)
    out = acc2 + b2_ref[...] + skip
    o_ref[0] = out.reshape(Ho, Wo, Cout).astype(o_ref.dtype)


# --------------------------------- JAX glue -----------------------------------

def _fold_params(p):
    """Fold inference BatchNorms into conv weights/biases; build the block-diagonal
    stage-A weight.  All zero blocks here are exact zeros (required for correctness)."""
    Cin = p["w1"].shape[2]
    Cout = p["w1"].shape[3]
    s1 = (p["bn1_g"] * jax.lax.rsqrt(p["bn1_v"] + EPS)).reshape(1, 1, 1, Cin)
    t1 = p["bn1_b"].reshape(1, 1, 1, Cin) - p["bn1_m"].reshape(1, 1, 1, Cin) * s1
    s2 = (p["bn2_g"] * jax.lax.rsqrt(p["bn2_v"] + EPS)).reshape(-1)
    s3 = (p["bn3_g"] * jax.lax.rsqrt(p["bn3_v"] + EPS)).reshape(-1)

    w1f = p["w1"] * s2.reshape(1, 1, 1, -1)
    b1f = p["b1"].reshape(-1) * s2 + p["bn2_b"].reshape(-1) - p["bn2_m"].reshape(-1) * s2
    w3f = p["w3"] * s3.reshape(1, 1, 1, -1)
    b3f = p["b3"].reshape(-1) * s3 + p["bn3_b"].reshape(-1) - p["bn3_m"].reshape(-1) * s3

    # Block-diagonal RHS so that [a | x] @ w13 = [a @ w1f | x @ w3f] in one MXU push.
    w13 = jnp.zeros((3, 3, 2 * Cin, 2 * Cout), jnp.float32)
    w13 = w13.at[:, :, :Cin, :Cout].set(w1f)
    w13 = w13.at[:, :, Cin:, Cout:].set(w3f)
    b13 = jnp.concatenate([b1f, b3f]).reshape(1, 2 * Cout)
    return s1, t1, w13, b13, p["w2"], p["b2"].reshape(1, -1)


def residual_conv_block(x, p):
    """x: [N, H, W, Cin] NHWC.  Returns [N, H//2, W//2, Cout]."""
    N, H, W, Cin = x.shape
    Cout = p["w1"].shape[3]
    assert H % 2 == 0 and W % 2 == 0, "stride-2 path assumes even spatial dims"
    Ho, Wo = H // 2, W // 2
    Hp, Wp = Ho + 1, Wo + 1             # (H+2)//2, (W+2)//2
    C2 = 2 * Cin

    s1, t1, w13, b13, w2, b2 = _fold_params(p)

    # BN1 + ReLU on the un-padded input, then zero-pad (Conv2d zero-pads the activated
    # tensor); the raw input rides along in the channel dim for the skip conv.
    a = jnp.maximum(x * s1 + t1, 0.0)
    axp = jnp.pad(jnp.concatenate([a, x], axis=-1), ((0, 0), (1, 1), (1, 1), (0, 0)))
    # Even/odd H & W phase planes: every (kh, kw) stride-2 tap becomes a contiguous
    # [Ho, Wo] window of one plane (static contiguous slices inside the kernel).
    ph = axp.reshape(N, Hp, 2, Wp, 2, C2).transpose(0, 2, 4, 1, 3, 5)
    ph = ph.reshape(N * 4, Hp, Wp, C2)

    kernel = functools.partial(fused_block_kernel, Ho=Ho, Wo=Wo, Cin=Cin, Cout=Cout)
    out = pl.pallas_call(
        kernel,
        grid=(N,),
        in_specs=[
            pl.BlockSpec((4, Hp, Wp, C2), lambda n: (n, 0, 0, 0)),        # 4 phase planes / sample
            pl.BlockSpec((3, 3, C2, 2 * Cout), lambda n: (0, 0, 0, 0)),   # weights stay resident
            pl.BlockSpec((1, 2 * Cout), lambda n: (0, 0)),
            pl.BlockSpec((3, 3, Cout, Cout), lambda n: (0, 0, 0, 0)),
            pl.BlockSpec((1, Cout), lambda n: (0, 0)),
        ],
        out_specs=pl.BlockSpec((1, Ho, Wo, Cout), lambda n: (n, 0, 0, 0)),
        out_shape=jax.ShapeDtypeStruct((N, Ho, Wo, Cout), jnp.float32),
        scratch_shapes=[pltpu.VMEM((Ho + 2, Wo + 2, Cout), jnp.float32)],
        compiler_params=pltpu.CompilerParams(
            dimension_semantics=("parallel",),            # N=2 -> both v7x TensorCores busy
            vmem_limit_bytes=4 * 1024 * 1024),            # actual working set is < 100 KiB
    )(ph, w13, b13, w2, b2)
    return out


# ----------------------------- pure-JAX reference ------------------------------

def ref_forward(x, p):
    def bn(y, g, b, m, v):
        return (y - m) * g / jnp.sqrt(v + EPS) + b

    def conv(y, w, b, stride):
        out = jax.lax.conv_general_dilated(
            y, w, (stride, stride), ((1, 1), (1, 1)),
            dimension_numbers=("NHWC", "HWIO", "NHWC"))
        return out + b.reshape(1, 1, 1, -1)

    a = jnp.maximum(bn(x, p["bn1_g"], p["bn1_b"], p["bn1_m"], p["bn1_v"]), 0.0)
    h = conv(a, p["w1"], p["b1"], 2)
    h = jnp.maximum(bn(h, p["bn2_g"], p["bn2_b"], p["bn2_m"], p["bn2_v"]), 0.0)
    h = conv(h, p["w2"], p["b2"], 1)
    s = conv(x, p["w3"], p["b3"], 2)
    s = bn(s, p["bn3_g"], p["bn3_b"], p["bn3_m"], p["bn3_v"])
    return h + s


# ----------------------------------- main --------------------------------------

def init_params(key, in_ch, out_ch):
    ks = jax.random.split(key, 16)
    def bn_params(k, c):
        k1, k2, k3, k4 = jax.random.split(k, 4)
        return (jax.random.uniform(k1, (1, c), jnp.float32, 0.5, 1.5),   # gamma
                0.1 * jax.random.normal(k2, (1, c), jnp.float32),        # beta
                0.1 * jax.random.normal(k3, (1, c), jnp.float32),        # running mean
                jax.random.uniform(k4, (1, c), jnp.float32, 0.5, 1.5))   # running var
    p = {}
    p["bn1_g"], p["bn1_b"], p["bn1_m"], p["bn1_v"] = bn_params(ks[0], in_ch)
    p["bn2_g"], p["bn2_b"], p["bn2_m"], p["bn2_v"] = bn_params(ks[1], out_ch)
    p["bn3_g"], p["bn3_b"], p["bn3_m"], p["bn3_v"] = bn_params(ks[2], out_ch)
    p["w1"] = 0.1 * jax.random.normal(ks[3], (3, 3, in_ch, out_ch), jnp.float32)
    p["b1"] = 0.1 * jax.random.normal(ks[4], (1, out_ch), jnp.float32)
    p["w2"] = 0.1 * jax.random.normal(ks[5], (3, 3, out_ch, out_ch), jnp.float32)
    p["b2"] = 0.1 * jax.random.normal(ks[6], (1, out_ch), jnp.float32)
    p["w3"] = 0.1 * jax.random.normal(ks[7], (3, 3, in_ch, out_ch), jnp.float32)
    p["b3"] = 0.1 * jax.random.normal(ks[8], (1, out_ch), jnp.float32)
    return p


if __name__ == "__main__":
    key = jax.random.PRNGKey(0)
    k_x, k_p = jax.random.split(key)
    # PyTorch NCHW (2, 4, 16, 16)  <->  NHWC (2, 16, 16, 4): identical math.
    N, H, W, in_ch, out_ch = 2, 16, 16, 4, 8
    x = jax.random.normal(k_x, (N, H, W, in_ch), jnp.float32)
    params = init_params(k_p, in_ch, out_ch)

    fwd = jax.jit(residual_conv_block)
    out = jax.block_until_ready(fwd(x, params))
    assert out.shape == (N, H // 2, W // 2, out_ch), out.shape

    ref = jax.block_until_ready(ref_forward(x, params))
    err = float(jnp.max(jnp.abs(out - ref)))
    assert err < 1e-3, err

    print("KERNEL_OK")
</pallas_src>

<mosaic_0001>
module attributes {stable_mosaic.version = 11 : i64} {
  func.func @fused_block_kernel(%arg0: i32, %arg1: memref<4x9x9x8xf32, #tpu.memory_space<vmem>>, %arg2: memref<3x3x8x16xf32, #tpu.memory_space<vmem>>, %arg3: memref<1x16xf32, #tpu.memory_space<vmem>>, %arg4: memref<3x3x8x8xf32, #tpu.memory_space<vmem>>, %arg5: memref<1x8xf32, #tpu.memory_space<vmem>>, %arg6: memref<1x8x8x8xf32, #tpu.memory_space<vmem>>, %arg7: memref<10x10x8xf32, #tpu.memory_space<vmem>>) attributes {dimension_semantics = [#tpu.dimension_semantics<parallel>], iteration_bounds = array<i64: 2>, scalar_prefetch = 0 : i64, scratch_operands = 1 : i64, tpu.core_type = #tpu.core_type<tc>, window_params = [{transform_indices = @transform_0, window_bounds = array<i64: 4, 9, 9, 8>}, {pipeline_mode = #tpu.pipeline_mode<synchronous>, transform_indices = @transform_1, window_bounds = array<i64: 3, 3, 8, 16>}, {pipeline_mode = #tpu.pipeline_mode<synchronous>, transform_indices = @transform_2, window_bounds = array<i64: 1, 16>}, {pipeline_mode = #tpu.pipeline_mode<synchronous>, transform_indices = @transform_3, window_bounds = array<i64: 3, 3, 8, 8>}, {pipeline_mode = #tpu.pipeline_mode<synchronous>, transform_indices = @transform_4, window_bounds = array<i64: 1, 8>}, {transform_indices = @transform_5, window_bounds = array<i64: 1, 8, 8, 8>}]} {
    %c0 = arith.constant 0 : index
    %c0_0 = arith.constant 0 : index
    %c0_1 = arith.constant 0 : index
    %c0_2 = arith.constant 0 : index
    %0 = vector.load %arg1[%c0, %c0_0, %c0_1, %c0_2] : memref<4x9x9x8xf32, #tpu.memory_space<vmem>>, vector<1x9x9x8xf32>
    %1 = vector.shape_cast %0 : vector<1x9x9x8xf32> to vector<9x9x8xf32>
    %c1 = arith.constant 1 : index
    %c0_3 = arith.constant 0 : index
    %c0_4 = arith.constant 0 : index
    %c0_5 = arith.constant 0 : index
    %2 = vector.load %arg1[%c1, %c0_3, %c0_4, %c0_5] : memref<4x9x9x8xf32, #tpu.memory_space<vmem>>, vector<1x9x9x8xf32>
    %3 = vector.shape_cast %2 : vector<1x9x9x8xf32> to vector<9x9x8xf32>
    %c2 = arith.constant 2 : index
    %c0_6 = arith.constant 0 : index
    %c0_7 = arith.constant 0 : index
    %c0_8 = arith.constant 0 : index
    %4 = vector.load %arg1[%c2, %c0_6, %c0_7, %c0_8] : memref<4x9x9x8xf32, #tpu.memory_space<vmem>>, vector<1x9x9x8xf32>
    %5 = vector.shape_cast %4 : vector<1x9x9x8xf32> to vector<9x9x8xf32>
    %c3 = arith.constant 3 : index
    %c0_9 = arith.constant 0 : index
    %c0_10 = arith.constant 0 : index
    %c0_11 = arith.constant 0 : index
    %6 = vector.load %arg1[%c3, %c0_9, %c0_10, %c0_11] : memref<4x9x9x8xf32, #tpu.memory_space<vmem>>, vector<1x9x9x8xf32>
    %7 = vector.shape_cast %6 : vector<1x9x9x8xf32> to vector<9x9x8xf32>
    %cst = arith.constant 0.000000e+00 : f32
    %8 = vector.broadcast %cst : f32 to vector<64x16xf32>
    %9 = vector.extract_strided_slice %1 {offsets = [0, 0, 0], sizes = [8, 8, 8], strides = [1, 1, 1]} : vector<9x9x8xf32> to vector<8x8x8xf32>
    %10 = vector.shape_cast %9 : vector<8x8x8xf32> to vector<64x8xf32>
    %c0_12 = arith.constant 0 : index
    %c0_13 = arith.constant 0 : index
    %c0_14 = arith.constant 0 : index
    %c0_15 = arith.constant 0 : index
    %11 = vector.load %arg2[%c0_12, %c0_13, %c0_14, %c0_15] : memref<3x3x8x16xf32, #tpu.memory_space<vmem>>, vector<1x1x8x16xf32>
    %12 = vector.shape_cast %11 : vector<1x1x8x16xf32> to vector<8x16xf32>
    %cst_16 = arith.constant dense<0.000000e+00> : vector<64x16xf32>
    %13 = tpu.matmul %10, %12, %cst_16 {dimension_numbers = #tpu.dot_dimension_numbers<[1], [0], [0], [1], [0, 0, 1, 1], [], []>} : vector<64x8xf32>, vector<8x16xf32>, vector<64x16xf32> -> vector<64x16xf32>
    %14 = arith.addf %8, %13 : vector<64x16xf32>
    %15 = vector.extract_strided_slice %3 {offsets = [0, 0, 0], sizes = [8, 8, 8], strides = [1, 1, 1]} : vector<9x9x8xf32> to vector<8x8x8xf32>
    %16 = vector.shape_cast %15 : vector<8x8x8xf32> to vector<64x8xf32>
    %c0_17 = arith.constant 0 : index
    %c1_18 = arith.constant 1 : index
    %c0_19 = arith.constant 0 : index
    %c0_20 = arith.constant 0 : index
    %17 = vector.load %arg2[%c0_17, %c1_18, %c0_19, %c0_20] : memref<3x3x8x16xf32, #tpu.memory_space<vmem>>, vector<1x1x8x16xf32>
    %18 = vector.shape_cast %17 : vector<1x1x8x16xf32> to vector<8x16xf32>
    %cst_21 = arith.constant dense<0.000000e+00> : vector<64x16xf32>
    %19 = tpu.matmul %16, %18, %cst_21 {dimension_numbers = #tpu.dot_dimension_numbers<[1], [0], [0], [1], [0, 0, 1, 1], [], []>} : vector<64x8xf32>, vector<8x16xf32>, vector<64x16xf32> -> vector<64x16xf32>
    %20 = arith.addf %14, %19 : vector<64x16xf32>
    %21 = vector.extract_strided_slice %1 {offsets = [0, 1, 0], sizes = [8, 8, 8], strides = [1, 1, 1]} : vector<9x9x8xf32> to vector<8x8x8xf32>
    %22 = vector.shape_cast %21 : vector<8x8x8xf32> to vector<64x8xf32>
    %c0_22 = arith.constant 0 : index
    %c2_23 = arith.constant 2 : index
    %c0_24 = arith.constant 0 : index
    %c0_25 = arith.constant 0 : index
    %23 = vector.load %arg2[%c0_22, %c2_23, %c0_24, %c0_25] : memref<3x3x8x16xf32, #tpu.memory_space<vmem>>, vector<1x1x8x16xf32>
    %24 = vector.shape_cast %23 : vector<1x1x8x16xf32> to vector<8x16xf32>
    %cst_26 = arith.constant dense<0.000000e+00> : vector<64x16xf32>
    %25 = tpu.matmul %22, %24, %cst_26 {dimension_numbers = #tpu.dot_dimension_numbers<[1], [0], [0], [1], [0, 0, 1, 1], [], []>} : vector<64x8xf32>, vector<8x16xf32>, vector<64x16xf32> -> vector<64x16xf32>
    %26 = arith.addf %20, %25 : vector<64x16xf32>
    %27 = vector.extract_strided_slice %5 {offsets = [0, 0, 0], sizes = [8, 8, 8], strides = [1, 1, 1]} : vector<9x9x8xf32> to vector<8x8x8xf32>
    %28 = vector.shape_cast %27 : vector<8x8x8xf32> to vector<64x8xf32>
    %c1_27 = arith.constant 1 : index
    %c0_28 = arith.constant 0 : index
    %c0_29 = arith.constant 0 : index
    %c0_30 = arith.constant 0 : index
    %29 = vector.load %arg2[%c1_27, %c0_28, %c0_29, %c0_30] : memref<3x3x8x16xf32, #tpu.memory_space<vmem>>, vector<1x1x8x16xf32>
    %30 = vector.shape_cast %29 : vector<1x1x8x16xf32> to vector<8x16xf32>
    %cst_31 = arith.constant dense<0.000000e+00> : vector<64x16xf32>
    %31 = tpu.matmul %28, %30, %cst_31 {dimension_numbers = #tpu.dot_dimension_numbers<[1], [0], [0], [1], [0, 0, 1, 1], [], []>} : vector<64x8xf32>, vector<8x16xf32>, vector<64x16xf32> -> vector<64x16xf32>
    %32 = arith.addf %26, %31 : vector<64x16xf32>
    %33 = vector.extract_strided_slice %7 {offsets = [0, 0, 0], sizes = [8, 8, 8], strides = [1, 1, 1]} : vector<9x9x8xf32> to vector<8x8x8xf32>
    %34 = vector.shape_cast %33 : vector<8x8x8xf32> to vector<64x8xf32>
    %c1_32 = arith.constant 1 : index
    %c1_33 = arith.constant 1 : index
    %c0_34 = arith.constant 0 : index
    %c0_35 = arith.constant 0 : index
    %35 = vector.load %arg2[%c1_32, %c1_33, %c0_34, %c0_35] : memref<3x3x8x16xf32, #tpu.memory_space<vmem>>, vector<1x1x8x16xf32>
    %36 = vector.shape_cast %35 : vector<1x1x8x16xf32> to vector<8x16xf32>
    %cst_36 = arith.constant dense<0.000000e+00> : vector<64x16xf32>
    %37 = tpu.matmul %34, %36, %cst_36 {dimension_numbers = #tpu.dot_dimension_numbers<[1], [0], [0], [1], [0, 0, 1, 1], [], []>} : vector<64x8xf32>, vector<8x16xf32>, vector<64x16xf32> -> vector<64x16xf32>
    %38 = arith.addf %32, %37 : vector<64x16xf32>
    %39 = vector.extract_strided_slice %5 {offsets = [0, 1, 0], sizes = [8, 8, 8], strides = [1, 1, 1]} : vector<9x9x8xf32> to vector<8x8x8xf32>
    %40 = vector.shape_cast %39 : vector<8x8x8xf32> to vector<64x8xf32>
    %c1_37 = arith.constant 1 : index
    %c2_38 = arith.constant 2 : index
    %c0_39 = arith.constant 0 : index
    %c0_40 = arith.constant 0 : index
    %41 = vector.load %arg2[%c1_37, %c2_38, %c0_39, %c0_40] : memref<3x3x8x16xf32, #tpu.memory_space<vmem>>, vector<1x1x8x16xf32>
    %42 = vector.shape_cast %41 : vector<1x1x8x16xf32> to vector<8x16xf32>
    %cst_41 = arith.constant dense<0.000000e+00> : vector<64x16xf32>
    %43 = tpu.matmul %40, %42, %cst_41 {dimension_numbers = #tpu.dot_dimension_numbers<[1], [0], [0], [1], [0, 0, 1, 1], [], []>} : vector<64x8xf32>, vector<8x16xf32>, vector<64x16xf32> -> vector<64x16xf32>
    %44 = arith.addf %38, %43 : vector<64x16xf32>
    %45 = vector.extract_strided_slice %1 {offsets = [1, 0, 0], sizes = [8, 8, 8], strides = [1, 1, 1]} : vector<9x9x8xf32> to vector<8x8x8xf32>
    %46 = vector.shape_cast %45 : vector<8x8x8xf32> to vector<64x8xf32>
    %c2_42 = arith.constant 2 : index
    %c0_43 = arith.constant 0 : index
    %c0_44 = arith.constant 0 : index
    %c0_45 = arith.constant 0 : index
    %47 = vector.load %arg2[%c2_42, %c0_43, %c0_44, %c0_45] : memref<3x3x8x16xf32, #tpu.memory_space<vmem>>, vector<1x1x8x16xf32>
    %48 = vector.shape_cast %47 : vector<1x1x8x16xf32> to vector<8x16xf32>
    %cst_46 = arith.constant dense<0.000000e+00> : vector<64x16xf32>
    %49 = tpu.matmul %46, %48, %cst_46 {dimension_numbers = #tpu.dot_dimension_numbers<[1], [0], [0], [1], [0, 0, 1, 1], [], []>} : vector<64x8xf32>, vector<8x16xf32>, vector<64x16xf32> -> vector<64x16xf32>
    %50 = arith.addf %44, %49 : vector<64x16xf32>
    %51 = vector.extract_strided_slice %3 {offsets = [1, 0, 0], sizes = [8, 8, 8], strides = [1, 1, 1]} : vector<9x9x8xf32> to vector<8x8x8xf32>
    %52 = vector.shape_cast %51 : vector<8x8x8xf32> to vector<64x8xf32>
    %c2_47 = arith.constant 2 : index
    %c1_48 = arith.constant 1 : index
    %c0_49 = arith.constant 0 : index
    %c0_50 = arith.constant 0 : index
    %53 = vector.load %arg2[%c2_47, %c1_48, %c0_49, %c0_50] : memref<3x3x8x16xf32, #tpu.memory_space<vmem>>, vector<1x1x8x16xf32>
    %54 = vector.shape_cast %53 : vector<1x1x8x16xf32> to vector<8x16xf32>
    %cst_51 = arith.constant dense<0.000000e+00> : vector<64x16xf32>
    %55 = tpu.matmul %52, %54, %cst_51 {dimension_numbers = #tpu.dot_dimension_numbers<[1], [0], [0], [1], [0, 0, 1, 1], [], []>} : vector<64x8xf32>, vector<8x16xf32>, vector<64x16xf32> -> vector<64x16xf32>
    %56 = arith.addf %50, %55 : vector<64x16xf32>
    %57 = vector.extract_strided_slice %1 {offsets = [1, 1, 0], sizes = [8, 8, 8], strides = [1, 1, 1]} : vector<9x9x8xf32> to vector<8x8x8xf32>
    %58 = vector.shape_cast %57 : vector<8x8x8xf32> to vector<64x8xf32>
    %c2_52 = arith.constant 2 : index
    %c2_53 = arith.constant 2 : index
    %c0_54 = arith.constant 0 : index
    %c0_55 = arith.constant 0 : index
    %59 = vector.load %arg2[%c2_52, %c2_53, %c0_54, %c0_55] : memref<3x3x8x16xf32, #tpu.memory_space<vmem>>, vector<1x1x8x16xf32>
    %60 = vector.shape_cast %59 : vector<1x1x8x16xf32> to vector<8x16xf32>
    %cst_56 = arith.constant dense<0.000000e+00> : vector<64x16xf32>
    %61 = tpu.matmul %58, %60, %cst_56 {dimension_numbers = #tpu.dot_dimension_numbers<[1], [0], [0], [1], [0, 0, 1, 1], [], []>} : vector<64x8xf32>, vector<8x16xf32>, vector<64x16xf32> -> vector<64x16xf32>
    %62 = arith.addf %56, %61 : vector<64x16xf32>
    %c0_57 = arith.constant 0 : index
    %c0_58 = arith.constant 0 : index
    %63 = vector.load %arg3[%c0_57, %c0_58] : memref<1x16xf32, #tpu.memory_space<vmem>>, vector<1x16xf32>
    %64 = vector.broadcast %63 : vector<1x16xf32> to vector<64x16xf32>
    %65 = arith.addf %62, %64 : vector<64x16xf32>
    %66 = vector.extract_strided_slice %65 {offsets = [0, 0], sizes = [64, 8], strides = [1, 1]} : vector<64x16xf32> to vector<64x8xf32>
    %cst_59 = arith.constant 0.000000e+00 : f32
    %67 = vector.broadcast %cst_59 : f32 to vector<64x8xf32>
    %68 = arith.maximumf %66, %67 : vector<64x8xf32>
    %69 = vector.extract_strided_slice %65 {offsets = [0, 8], sizes = [64, 8], strides = [1, 1]} : vector<64x16xf32> to vector<64x8xf32>
    %cst_60 = arith.constant 0.000000e+00 : f32
    %70 = vector.broadcast %cst_60 : f32 to vector<10x10x8xf32>
    %c0_61 = arith.constant 0 : index
    %c0_62 = arith.constant 0 : index
    %c0_63 = arith.constant 0 : index
    %71 = vector.load %arg7[%c0_61, %c0_62, %c0_63] : memref<10x10x8xf32, #tpu.memory_space<vmem>>, vector<10x10x8xf32>
    tpu.vector_store %arg7[%c0_61, %c0_62, %c0_63], %70 {strides = array<i32>} : memref<10x10x8xf32, #tpu.memory_space<vmem>>, vector<10x10x8xf32>,
    %72 = vector.shape_cast %68 : vector<64x8xf32> to vector<8x8x8xf32>
    %c1_64 = arith.constant 1 : index
    %c1_65 = arith.constant 1 : index
    %c0_66 = arith.constant 0 : index
    %73 = vector.load %arg7[%c1_64, %c1_65, %c0_66] : memref<10x10x8xf32, #tpu.memory_space<vmem>>, vector<8x8x8xf32>
    tpu.vector_store %arg7[%c1_64, %c1_65, %c0_66], %72 {strides = array<i32>} : memref<10x10x8xf32, #tpu.memory_space<vmem>>, vector<8x8x8xf32>,
    %c0_67 = arith.constant 0 : index
    %c0_68 = arith.constant 0 : index
    %c0_69 = arith.constant 0 : index
    %74 = vector.load %arg7[%c0_67, %c0_68, %c0_69] : memref<10x10x8xf32, #tpu.memory_space<vmem>>, vector<10x10x8xf32>
    %cst_70 = arith.constant 0.000000e+00 : f32
    %75 = vector.broadcast %cst_70 : f32 to vector<64x8xf32>
    %76 = vector.extract_strided_slice %74 {offsets = [0, 0, 0], sizes = [8, 8, 8], strides = [1, 1, 1]} : vector<10x10x8xf32> to vector<8x8x8xf32>
    %77 = vector.shape_cast %76 : vector<8x8x8xf32> to vector<64x8xf32>
    %c0_71 = arith.constant 0 : index
    %c0_72 = arith.constant 0 : index
    %c0_73 = arith.constant 0 : index
    %c0_74 = arith.constant 0 : index
    %78 = vector.load %arg4[%c0_71, %c0_72, %c0_73, %c0_74] : memref<3x3x8x8xf32, #tpu.memory_space<vmem>>, vector<1x1x8x8xf32>
    %79 = vector.shape_cast %78 : vector<1x1x8x8xf32> to vector<8x8xf32>
    %cst_75 = arith.constant dense<0.000000e+00> : vector<64x8xf32>
    %80 = tpu.matmul %77, %79, %cst_75 {dimension_numbers = #tpu.dot_dimension_numbers<[1], [0], [0], [1], [0, 0, 1, 1], [], []>} : vector<64x8xf32>, vector<8x8xf32>, vector<64x8xf32> -> vector<64x8xf32>
    %81 = arith.addf %75, %80 : vector<64x8xf32>
    %82 = vector.extract_strided_slice %74 {offsets = [0, 1, 0], sizes = [8, 8, 8], strides = [1, 1, 1]} : vector<10x10x8xf32> to vector<8x8x8xf32>
    %83 = vector.shape_cast %82 : vector<8x8x8xf32> to vector<64x8xf32>
    %c0_76 = arith.constant 0 : index
    %c1_77 = arith.constant 1 : index
    %c0_78 = arith.constant 0 : index
    %c0_79 = arith.constant 0 : index
    %84 = vector.load %arg4[%c0_76, %c1_77, %c0_78, %c0_79] : memref<3x3x8x8xf32, #tpu.memory_space<vmem>>, vector<1x1x8x8xf32>
    %85 = vector.shape_cast %84 : vector<1x1x8x8xf32> to vector<8x8xf32>
    %cst_80 = arith.constant dense<0.000000e+00> : vector<64x8xf32>
    %86 = tpu.matmul %83, %85, %cst_80 {dimension_numbers = #tpu.dot_dimension_numbers<[1], [0], [0], [1], [0, 0, 1, 1], [], []>} : vector<64x8xf32>, vector<8x8xf32>, vector<64x8xf32> -> vector<64x8xf32>
    %87 = arith.addf %81, %86 : vector<64x8xf32>
    %88 = vector.extract_strided_slice %74 {offsets = [0, 2, 0], sizes = [8, 8, 8], strides = [1, 1, 1]} : vector<10x10x8xf32> to vector<8x8x8xf32>
    %89 = vector.shape_cast %88 : vector<8x8x8xf32> to vector<64x8xf32>
    %c0_81 = arith.constant 0 : index
    %c2_82 = arith.constant 2 : index
    %c0_83 = arith.constant 0 : index
    %c0_84 = arith.constant 0 : index
    %90 = vector.load %arg4[%c0_81, %c2_82, %c0_83, %c0_84] : memref<3x3x8x8xf32, #tpu.memory_space<vmem>>, vector<1x1x8x8xf32>
    %91 = vector.shape_cast %90 : vector<1x1x8x8xf32> to vector<8x8xf32>
    %cst_85 = arith.constant dense<0.000000e+00> : vector<64x8xf32>
    %92 = tpu.matmul %89, %91, %cst_85 {dimension_numbers = #tpu.dot_dimension_numbers<[1], [0], [0], [1], [0, 0, 1, 1], [], []>} : vector<64x8xf32>, vector<8x8xf32>, vector<64x8xf32> -> vector<64x8xf32>
    %93 = arith.addf %87, %92 : vector<64x8xf32>
    %94 = vector.extract_strided_slice %74 {offsets = [1, 0, 0], sizes = [8, 8, 8], strides = [1, 1, 1]} : vector<10x10x8xf32> to vector<8x8x8xf32>
    %95 = vector.shape_cast %94 : vector<8x8x8xf32> to vector<64x8xf32>
    %c1_86 = arith.constant 1 : index
    %c0_87 = arith.constant 0 : index
    %c0_88 = arith.constant 0 : index
    %c0_89 = arith.constant 0 : index
    %96 = vector.load %arg4[%c1_86, %c0_87, %c0_88, %c0_89] : memref<3x3x8x8xf32, #tpu.memory_space<vmem>>, vector<1x1x8x8xf32>
    %97 = vector.shape_cast %96 : vector<1x1x8x8xf32> to vector<8x8xf32>
    %cst_90 = arith.constant dense<0.000000e+00> : vector<64x8xf32>
    %98 = tpu.matmul %95, %97, %cst_90 {dimension_numbers = #tpu.dot_dimension_numbers<[1], [0], [0], [1], [0, 0, 1, 1], [], []>} : vector<64x8xf32>, vector<8x8xf32>, vector<64x8xf32> -> vector<64x8xf32>
    %99 = arith.addf %93, %98 : vector<64x8xf32>
    %100 = vector.extract_strided_slice %74 {offsets = [1, 1, 0], sizes = [8, 8, 8], strides = [1, 1, 1]} : vector<10x10x8xf32> to vector<8x8x8xf32>
    %101 = vector.shape_cast %100 : vector<8x8x8xf32> to vector<64x8xf32>
    %c1_91 = arith.constant 1 : index
    %c1_92 = arith.constant 1 : index
    %c0_93 = arith.constant 0 : index
    %c0_94 = arith.constant 0 : index
    %102 = vector.load %arg4[%c1_91, %c1_92, %c0_93, %c0_94] : memref<3x3x8x8xf32, #tpu.memory_space<vmem>>, vector<1x1x8x8xf32>
    %103 = vector.shape_cast %102 : vector<1x1x8x8xf32> to vector<8x8xf32>
    %cst_95 = arith.constant dense<0.000000e+00> : vector<64x8xf32>
    %104 = tpu.matmul %101, %103, %cst_95 {dimension_numbers = #tpu.dot_dimension_numbers<[1], [0], [0], [1], [0, 0, 1, 1], [], []>} : vector<64x8xf32>, vector<8x8xf32>, vector<64x8xf32> -> vector<64x8xf32>
    %105 = arith.addf %99, %104 : vector<64x8xf32>
    %106 = vector.extract_strided_slice %74 {offsets = [1, 2, 0], sizes = [8, 8, 8], strides = [1, 1, 1]} : vector<10x10x8xf32> to vector<8x8x8xf32>
    %107 = vector.shape_cast %106 : vector<8x8x8xf32> to vector<64x8xf32>
    %c1_96 = arith.constant 1 : index
    %c2_97 = arith.constant 2 : index
    %c0_98 = arith.constant 0 : index
    %c0_99 = arith.constant 0 : index
    %108 = vector.load %arg4[%c1_96, %c2_97, %c0_98, %c0_99] : memref<3x3x8x8xf32, #tpu.memory_space<vmem>>, vector<1x1x8x8xf32>
    %109 = vector.shape_cast %108 : vector<1x1x8x8xf32> to vector<8x8xf32>
    %cst_100 = arith.constant dense<0.000000e+00> : vector<64x8xf32>
    %110 = tpu.matmul %107, %109, %cst_100 {dimension_numbers = #tpu.dot_dimension_numbers<[1], [0], [0], [1], [0, 0, 1, 1], [], []>} : vector<64x8xf32>, vector<8x8xf32>, vector<64x8xf32> -> vector<64x8xf32>
    %111 = arith.addf %105, %110 : vector<64x8xf32>
    %112 = vector.extract_strided_slice %74 {offsets = [2, 0, 0], sizes = [8, 8, 8], strides = [1, 1, 1]} : vector<10x10x8xf32> to vector<8x8x8xf32>
    %113 = vector.shape_cast %112 : vector<8x8x8xf32> to vector<64x8xf32>
    %c2_101 = arith.constant 2 : index
    %c0_102 = arith.constant 0 : index
    %c0_103 = arith.constant 0 : index
    %c0_104 = arith.constant 0 : index
    %114 = vector.load %arg4[%c2_101, %c0_102, %c0_103, %c0_104] : memref<3x3x8x8xf32, #tpu.memory_space<vmem>>, vector<1x1x8x8xf32>
    %115 = vector.shape_cast %114 : vector<1x1x8x8xf32> to vector<8x8xf32>
    %cst_105 = arith.constant dense<0.000000e+00> : vector<64x8xf32>
    %116 = tpu.matmul %113, %115, %cst_105 {dimension_numbers = #tpu.dot_dimension_numbers<[1], [0], [0], [1], [0, 0, 1, 1], [], []>} : vector<64x8xf32>, vector<8x8xf32>, vector<64x8xf32> -> vector<64x8xf32>
    %117 = arith.addf %111, %116 : vector<64x8xf32>
    %118 = vector.extract_strided_slice %74 {offsets = [2, 1, 0], sizes = [8, 8, 8], strides = [1, 1, 1]} : vector<10x10x8xf32> to vector<8x8x8xf32>
    %119 = vector.shape_cast %118 : vector<8x8x8xf32> to vector<64x8xf32>
    %c2_106 = arith.constant 2 : index
    %c1_107 = arith.constant 1 : index
    %c0_108 = arith.constant 0 : index
    %c0_109 = arith.constant 0 : index
    %120 = vector.load %arg4[%c2_106, %c1_107, %c0_108, %c0_109] : memref<3x3x8x8xf32, #tpu.memory_space<vmem>>, vector<1x1x8x8xf32>
    %121 = vector.shape_cast %120 : vector<1x1x8x8xf32> to vector<8x8xf32>
    %cst_110 = arith.constant dense<0.000000e+00> : vector<64x8xf32>
    %122 = tpu.matmul %119, %121, %cst_110 {dimension_numbers = #tpu.dot_dimension_numbers<[1], [0], [0], [1], [0, 0, 1, 1], [], []>} : vector<64x8xf32>, vector<8x8xf32>, vector<64x8xf32> -> vector<64x8xf32>
    %123 = arith.addf %117, %122 : vector<64x8xf32>
    %124 = vector.extract_strided_slice %74 {offsets = [2, 2, 0], sizes = [8, 8, 8], strides = [1, 1, 1]} : vector<10x10x8xf32> to vector<8x8x8xf32>
    %125 = vector.shape_cast %124 : vector<8x8x8xf32> to vector<64x8xf32>
    %c2_111 = arith.constant 2 : index
    %c2_112 = arith.constant 2 : index
    %c0_113 = arith.constant 0 : index
    %c0_114 = arith.constant 0 : index
    %126 = vector.load %arg4[%c2_111, %c2_112, %c0_113, %c0_114] : memref<3x3x8x8xf32, #tpu.memory_space<vmem>>, vector<1x1x8x8xf32>
    %127 = vector.shape_cast %126 : vector<1x1x8x8xf32> to vector<8x8xf32>
    %cst_115 = arith.constant dense<0.000000e+00> : vector<64x8xf32>
    %128 = tpu.matmul %125, %127, %cst_115 {dimension_numbers = #tpu.dot_dimension_numbers<[1], [0], [0], [1], [0, 0, 1, 1], [], []>} : vector<64x8xf32>, vector<8x8xf32>, vector<64x8xf32> -> vector<64x8xf32>
    %129 = arith.addf %123, %128 : vector<64x8xf32>
    %c0_116 = arith.constant 0 : index
    %c0_117 = arith.constant 0 : index
    %130 = vector.load %arg5[%c0_116, %c0_117] : memref<1x8xf32, #tpu.memory_space<vmem>>, vector<1x8xf32>
    %131 = vector.broadcast %130 : vector<1x8xf32> to vector<64x8xf32>
    %132 = arith.addf %129, %131 : vector<64x8xf32>
    %133 = arith.addf %132, %69 : vector<64x8xf32>
    %134 = vector.shape_cast %133 : vector<64x8xf32> to vector<8x8x8xf32>
    %c0_118 = arith.constant 0 : index
    %c0_119 = arith.constant 0 : index
    %c0_120 = arith.constant 0 : index
    %c0_121 = arith.constant 0 : index
    %135 = vector.load %arg6[%c0_118, %c0_119, %c0_120, %c0_121] : memref<1x8x8x8xf32, #tpu.memory_space<vmem>>, vector<1x8x8x8xf32>
    %136 = vector.shape_cast %135 : vector<1x8x8x8xf32> to vector<8x8x8xf32>
    %137 = vector.shape_cast %134 : vector<8x8x8xf32> to vector<1x8x8x8xf32>
    tpu.vector_store %arg6[%c0_118, %c0_119, %c0_120, %c0_121], %137 {strides = array<i32>} : memref<1x8x8x8xf32, #tpu.memory_space<vmem>>, vector<1x8x8x8xf32>,
    return
  }
  func.func @transform_0(%arg0: i32) -> (i32, i32, i32, i32) {
    %c0_i32 = arith.constant 0 : i32
    %c0_i32_0 = arith.constant 0 : i32
    %c0_i32_1 = arith.constant 0 : i32
    %c0_i32_2 = arith.constant 0 : i32
    return %arg0, %c0_i32, %c0_i32_0, %c0_i32_1 : i32, i32, i32, i32
  }
  func.func @transform_1(%arg0: i32) -> (i32, i32, i32, i32) {
    %c0_i32 = arith.constant 0 : i32
    %c0_i32_0 = arith.constant 0 : i32
    %c0_i32_1 = arith.constant 0 : i32
    %c0_i32_2 = arith.constant 0 : i32
    %c0_i32_3 = arith.constant 0 : i32
    return %c0_i32, %c0_i32_0, %c0_i32_1, %c0_i32_2 : i32, i32, i32, i32
  }
  func.func @transform_2(%arg0: i32) -> (i32, i32) {
    %c0_i32 = arith.constant 0 : i32
    %c0_i32_0 = arith.constant 0 : i32
    %c0_i32_1 = arith.constant 0 : i32
    return %c0_i32, %c0_i32_0 : i32, i32
  }
  func.func @transform_3(%arg0: i32) -> (i32, i32, i32, i32) {
    %c0_i32 = arith.constant 0 : i32
    %c0_i32_0 = arith.constant 0 : i32
    %c0_i32_1 = arith.constant 0 : i32
    %c0_i32_2 = arith.constant 0 : i32
    %c0_i32_3 = arith.constant 0 : i32
    return %c0_i32, %c0_i32_0, %c0_i32_1, %c0_i32_2 : i32, i32, i32, i32
  }
  func.func @transform_4(%arg0: i32) -> (i32, i32) {
    %c0_i32 = arith.constant 0 : i32
    %c0_i32_0 = arith.constant 0 : i32
    %c0_i32_1 = arith.constant 0 : i32
    return %c0_i32, %c0_i32_0 : i32, i32
  }
  func.func @transform_5(%arg0: i32) -> (i32, i32, i32, i32) {
    %c0_i32 = arith.constant 0 : i32
    %c0_i32_0 = arith.constant 0 : i32
    %c0_i32_1 = arith.constant 0 : i32
    %c0_i32_2 = arith.constant 0 : i32
    return %arg0, %c0_i32, %c0_i32_0, %c0_i32_1 : i32, i32, i32, i32
  }
}

</mosaic_0001>

<bundles_post_ra>
// kernel: residual_conv_block.1
= control target key start
LH: loop header
LB: loop body
LE: loop exit
PB: predicated region body
PF: predicated region fallthrough
CT: control target
= control target key end

     0   :  { %10 = vsyncpa [#allocation4], 0  ;;  %s2866_s0 = inlined_call_operand.vmem [shape: f32[8,9,9,8], index: 0, kind: input, shape index: {}]   ;;  %s2867_s1 = inlined_call_operand.vmem [shape: f32[3,3,8,16], index: 1, kind: input, shape index: {}]   ;;  %s2868_s2 = inlined_call_operand.vmem [shape: f32[1,16], index: 2, kind: input, shape index: {}]   ;;  %s2869_s3 = inlined_call_operand.vmem [shape: f32[3,3,8,8], index: 3, kind: input, shape index: {}]   ;;  %s2870_s4 = inlined_call_operand.vmem [shape: f32[1,8], index: 4, kind: input, shape index: {}]   ;;  %s2871_s5 = inlined_call_operand.hbm [shape: f32[2,8,8,8], index: 5, kind: output, shape index: {}]  }
   0x1   :  { %12 = vsyncpa [#allocation4 + $0x1], 0  ;;  %s2073_s18 = smov 0   ;;  %s2075_s19 = smov 0  }
   0x2   :  { %s2077_s20 = smov 0   ;;  %s2079_s21 = smov 0  }
   0x3 LB: > { %s2094_s22 = sadd.s32 4294967295, %s2037_s21   ;;  %s1721_s23 = sadd.s32 4294967294, %s2037_s21   ;;  %s2037_s21 = sphi %s2079_s21, %s2877_s21   ;;  %s2033_s20 = sphi %s2077_s20, %s2876_s20   ;;  %s2029_s19 = sphi %s2075_s19, %s2875_s19   ;;  %s2025_s18 = sphi %s2073_s18, %s2874_s18  }
   0x4   : > { %s2098_s24 = sadd.s32 1, %s2037_s21   ;;  %s135_s25 = sadd.s32 1, %s2033_s20 }
   0x5   : > { %s132_s26 = ssub.s32 %s2037_s21, %s2098_s24  ;;  %p145_p0 = scmp.ne.s32.totalorder %s2033_s20, %s2029_s19 }
   0x6   : > { %p133_p1 = scmp.eq.s32.totalorder %s132_s26, 0  ;;  %p146_p2 = scmp.eq.s32.totalorder %s2094_s22, 1 }
   0x7   : > { %p151_p3 = scmp.ne.s32.totalorder %s2029_s19, %s2025_s18  ;;  %p152_p4 = scmp.eq.s32.totalorder %s1721_s23, 1 }
   0x8   : > { %s2109_s27 = scalar_select %p133_p1, %s2033_s20, %s135_s25  }
   0x9   : > { %p2111_p5 = por %p146_p2, %p145_p0  ;;  %p2115_p6 = por %p152_p4, %p151_p3 }
   0xa   : > { %p1724_p7 = scmp.ge.s32.totalorder %s2037_s21, 1  ;;  %p192_p8 = scmp.lt.s32.totalorder %s2037_s21, 3 }
   0xc   : > { %p193_p9 = pnand %p1724_p7, %p192_p8 }
   0xd   : > { %s1726_s9 = sshll.u32 (!%p193_p9), %s2094_s22, 2  ;;  %s2040_s8 = smov (!%p193_p9), 120  }
   0xe   : > { %196 = sbr.rel (%p193_p9) target bundleno = 585 (0x249), region = 40  ;;  %p222_p10 = scmp.lt.s32.totalorder (!%p193_p9), %s1726_s9, 7 }
   0xf   : > { %s218_s17 = sand.u32 (!%p193_p9), 1, %s2029_s19   ;;  %s1926_s6 = sshll.u32 (!%p193_p9), %s2094_s22, 6 }
  0x10   : > { %s1725_s26 = sshll.u32 (!%p193_p9), %s218_s17, 6  ;;  %s1644_s22 = scalar_lea.sflag (!%p193_p9), [#allocation4], %s218_s17 }
  0x11   : > { %s2786_s30 = scalar_lea.vmem (!%p193_p9), [#allocation3], %s1725_s26 }
  0x12   : > { %s1656_s10 = sshll.u32 (!%p193_p9), %s2786_s30, 4  ;;  %s1657_s10 = int_to_ptr.vmem [resolvable:$true] %s1656_s10 }
  0x13   : > { %v1761_v0 = vld [vmem:[%s2867_s1 + $0x8] sm:$0xff]  ;;  %v282_v1 = vld [vmem:[%s2867_s1] sm:$0xff]  ;;  %v1778_v2 = vld [vmem:[%s2867_s1 + $0x10] sm:$0xff]  ;;  %s2879_s9 = smov (!%p222_p10, %s1726_s9), 7  ;;  %vm285_vm0 = vcmask 64512   ;;  %vm424_vm1 = vcmask 1046528  }
  0x14   : > { %1927 = vmatpush.msra.mxu2 %v1761_v0  ;;  %1928 = vmatpush.msra.mxu3 %v282_v1  ;;  %v1787_v3 = vld [vmem:[%s2867_s1 + $0x18] sm:$0xff]  ;;  %v1796_v4 = vld [vmem:[%s2867_s1 + $0x20] sm:$0xff]  ;;  %s1929_s16 = smul.u32 144, %s2879_s9  ;;  %v1814_v9 = vld [vmem:[%s2867_s1 + $0x30] sm:$0xff]  ;;  %vm951_vm2 = vcmask 58368   ;;  %vm1157_vm3 = vcmask 1045504   ;;  %s1655_s9 = scalar_lea.hbm %s2871_s5, %s1926_s6 }
  0x15   : > { %325 = vmatpush.msra.mxu0 %v1761_v0  ;;  %390 = vmatpush.msra.mxu1 %v282_v1  ;;  %v1823_v12 = vld [vmem:[%s2867_s1 + $0x38] sm:$0xff]  ;;  %v1832_v15 = vld [vmem:[%s2867_s1 + $0x40] sm:$0xff]  ;;  %v1805_v16 = vld [vmem:[%s2867_s1 + $0x28] sm:$0xff]  ;;  %s1658_s11 = sshll.u32 %s1655_s9, 4  ;;  %s1659_s11 = int_to_ptr.hbm [resolvable:$true] %s1658_s11 }
  0x16   : > { %482 = vmatpush.msrb.mxu2 %v1778_v2  ;;  %557 = vmatpush.msrb.mxu3 %v1787_v3  ;;  %s2140_s25 = scalar_lea.vmem %s2866_s0, %s1929_s16  ;;  %s1989_s12 = sshra.s32 %s1659_s11, 4  ;;  %s1990_s12 = int_to_ptr.hbm [resolvable:$true] %s1989_s12 }
  0x17   : > { %632 = vmatpush.msrb.mxu0 %v1796_v4  ;;  %v2143_v5 = vld [vmem:[%s2140_s25 + $0xd0] sm:$0xff]  ;;  %v2146_v6 = vld [vmem:[%s2140_s25 + $0x40] sm:$0xff]  ;;  %731 = vmatpush.msrb.mxu1 %v1805_v16  ;;  %v229_v23 = vld [vmem:[%s2140_s25 + $0x8] sm:$0x1]  ;;  %s1991_s13 = scalar_lea.hbm %s1990_s12, 64  ;;  %s1995_s16 = scalar_lea.hbm %s2871_s5, 128 }
  0x18   : > { %1766 = vmatmul.msk.f32.vlgmr.msra.gmra.mxu2 %vm285_vm0, %v2143_v5  ;;  %1774 = vmatmul.msk.f32.vlgmr.msra.gmra.mxu3 %vm285_vm0, %v2146_v6  ;;  %v1728_v7 = vld [vmem:[%s2140_s25 + $0x90] sm:$0xff]  ;;  %v228_v8 = vld [vmem:[%s2140_s25] sm:$0xff]  ;;  %v1738_v26 = vld [vmem:[%s2140_s25 + $0x128] sm:$0x1]  ;;  %v426_v28 = vrot.slane %v229_v23, 1  ;;  %v437_v3 = vrot.slane %v2146_v6, 1  ;;  %p1992_p11 = scmp.ne.s32.totalorder %s1990_s12, %s1991_s13  ;;  %p1996_p0 = scmp.lt.s32.totalorder %s1990_s12, %s2871_s5 }
  0x19   : > { %1762 = vmatmul.msk.f32.vlgmr.msra.gmra.mxu0 %vm285_vm0, %v1728_v7  ;;  %1770 = vmatmul.msk.f32.vlgmr.msra.gmra.mxu1 %vm285_vm0, %v228_v8  ;;  %v2160_v10 = vld [vmem:[%s2140_s25 + $0xe0] sm:$0xff]  ;;  %v2163_v11 = vld [vmem:[%s2140_s25 + $0x50] sm:$0xff]  ;;  %v425_v27 = vrot.slane %v228_v8, 1  ;;  %v675_v31 = vrot.slane %v1738_v26, 1  ;;  %v231_v33 = vld [vmem:[%s2140_s25 + $0x18] sm:$0x1]  ;;  %p1997_p1 = scmp.lt.s32.totalorder %s1995_s16, %s1991_s13 }
  0x1a   : > { %785 = vmatpush.msra.mxu2 %v1814_v9  ;;  %v2169_v13 = vld [vmem:[%s2140_s25 + $0xa0] sm:$0xff]  ;;  %v2172_v14 = vld [vmem:[%s2140_s25 + $0x10] sm:$0xff]  ;;  %839 = vmatpush.msra.mxu3 %v1823_v12  ;;  %v1740_v36 = vld [vmem:[%s2140_s25 + $0x138] sm:$0x1]  ;;  %v429_v38 = vrot.slane %v231_v33, 1  ;;  %p1993_p12 = pnand %p1992_p11, %p2111_p5 }
  0x1b   : > { %896 = vmatpush.msra.mxu0 %v1832_v15  ;;  %v2189_v17 = vld [vmem:[%s2140_s25 + $0xf0] sm:$0xff]  ;;  %v2192_v18 = vld [vmem:[%s2140_s25 + $0x60] sm:$0xff]  ;;  %v427_v32 = vsel %vm424_vm1, %v425_v27, %v426_v28  ;;  %v428_v37 = vrot.slane %v2172_v14, 1  ;;  %v678_v41 = vrot.slane %v1740_v36, 1  ;;  %v233_v43 = vld [vmem:[%s2140_s25 + $0x28] sm:$0x1]  ;;  %p1998_p2 = por %p1997_p1, %p1996_p0 }
  0x1c   : > { %v2195_v19 = vld [vmem:[%s2140_s25 + $0xb0] sm:$0xff]  ;;  %v2198_v20 = vld [vmem:[%s2140_s25 + $0x20] sm:$0xff]  ;;  %v1742_v46 = vld [vmem:[%s2140_s25 + $0x148] sm:$0x1]  ;;  %v432_v48 = vrot.slane %v233_v43, 1  ;;  %v440_v27 = vrot.slane %v2163_v11, 1  ;;  %p1994_p13 = pneg %p1993_p12 }
  0x1d   : > { %v2209_v21 = vld [vmem:[%s2140_s25 + $0x100] sm:$0xff]  ;;  %v2212_v22 = vld [vmem:[%s2140_s25 + $0x70] sm:$0xff]  ;;  %v2243_v42 = vsel %vm424_vm1, %v428_v37, %v429_v38  ;;  %v431_v47 = vrot.slane %v2198_v20, 1  ;;  %v681_v51 = vrot.slane %v1742_v46, 1  ;;  %v235_v53 = vld [vmem:[%s2140_s25 + $0x38] sm:$0x1] }
  0x1e   : > { %v2216_v24 = vld [vmem:[%s2140_s25 + $0xc0] sm:$0xff]  ;;  %v2219_v25 = vld [vmem:[%s2140_s25 + $0x30] sm:$0xff]  ;;  %v1744_v56 = vld [vmem:[%s2140_s25 + $0x158] sm:$0x1]  ;;  %v435_v58 = vrot.slane %v235_v53, 1  ;;  %v443_v37 = vrot.slane %v2192_v18, 1  ;;  %p1999_p3 = pnand %p1998_p2, %p1994_p13 }
  0x1f   : > { %v1737_v29 = vld [vmem:[%s2140_s25 + $0x120] sm:$0xff]  ;;  %v1753_v34 = vld [vmem:[%s2140_s25 + $0x1b0] sm:$0xff]  ;;  %v2257_v52 = vsel %vm424_vm1, %v431_v47, %v432_v48  ;;  %v434_v57 = vrot.slane %v2219_v25, 1  ;;  %v684_v61 = vrot.slane %v1744_v56, 1  ;;  %v237_v63 = vld [vmem:[%s2140_s25 + $0x48] sm:$0x1] }
  0x20   : > { %1767 = vmatmul.msk.f32.gmra.mxu2 %vm285_vm0, %v2160_v10  ;;  %1775 = vmatmul.msk.f32.gmra.mxu3 %vm285_vm0, %v2163_v11  ;;  %v674_v30 = vrot.slane %v1737_v29, 1  ;;  %v1739_v39 = vld [vmem:[%s2140_s25 + $0x130] sm:$0xff]  ;;  %v1754_v44 = vld [vmem:[%s2140_s25 + $0x1c0] sm:$0xff]  ;;  %v1746_v2 = vld [vmem:[%s2140_s25 + $0x168] sm:$0x1]  ;;  %v438_v4 = vrot.slane %v237_v63, 1 }
  0x21   : > { %1763 = vmatmul.msk.f32.gmra.mxu0 %vm285_vm0, %v2169_v13  ;;  %1771 = vmatmul.msk.f32.gmra.mxu1 %vm285_vm0, %v2172_v14  ;;  %v677_v40 = vrot.slane %v1739_v39, 1  ;;  %v1741_v49 = vld [vmem:[%s2140_s25 + $0x140] sm:$0xff]  ;;  %v1755_v54 = vld [vmem:[%s2140_s25 + $0x1d0] sm:$0xff]  ;;  %v2271_v62 = vsel %vm424_vm1, %v434_v57, %v435_v58  ;;  %v687_v9 = vrot.slane %v1746_v2, 1  ;;  %v239_v15 = vld [vmem:[%s2140_s25 + $0x58] sm:$0x1] }
  0x22   : > { %v676_v35 = vsel %vm424_vm1, %v674_v30, %v675_v31  ;;  %v680_v50 = vrot.slane %v1741_v49, 1  ;;  %v1743_v59 = vld [vmem:[%s2140_s25 + $0x150] sm:$0xff]  ;;  %v1756_v0 = vld [vmem:[%s2140_s25 + $0x1e0] sm:$0xff]  ;;  %v439_v12 = vsel %vm424_vm1, %v437_v3, %v438_v4  ;;  %v1748_v26 = vld [vmem:[%s2140_s25 + $0x178] sm:$0x1]  ;;  %v441_v28 = vrot.slane %v239_v15, 1 }
  0x23   : > { %v679_v45 = vsel %vm424_vm1, %v677_v40, %v678_v41  ;;  %v683_v60 = vrot.slane %v1743_v59, 1  ;;  %v1745_v7 = vld [vmem:[%s2140_s25 + $0x160] sm:$0xff]  ;;  %v1757_v16 = vld [vmem:[%s2140_s25 + $0x1f0] sm:$0xff]  ;;  %v690_v31 = vrot.slane %v1748_v26, 1  ;;  %v241_v33 = vld [vmem:[%s2140_s25 + $0x68] sm:$0x1] }
  0x24   : > { %v682_v55 = vsel %vm424_vm1, %v680_v50, %v681_v51  ;;  %v686_v8 = vrot.slane %v1745_v7, 1  ;;  %v1750_v36 = vld [vmem:[%s2140_s25 + $0x188] sm:$0x1]  ;;  %v444_v38 = vrot.slane %v241_v33, 1  ;;  %v1752_v47 = vld [vmem:[%s2140_s25 + $0x198] sm:$0x1] }
  0x25   : > { %v685_v1 = vsel %vm424_vm1, %v683_v60, %v684_v61  ;;  %v693_v41 = vrot.slane %v1750_v36, 1  ;;  %v446_v48 = vrot.slane %v2212_v22, 1  ;;  %v1751_v50 = vld [vmem:[%s2140_s25 + $0x190] sm:$0xff]  ;;  %v696_v53 = vrot.slane %v1752_v47, 1 }
  0x26   : > { %v688_v23 = vsel %vm424_vm1, %v686_v8, %v687_v9  ;;  %v445_v43 = vsel %vm424_vm1, %v443_v37, %v444_v38  ;;  %v695_v51 = vrot.slane %v1751_v50, 1  ;;  %v1736_v57 = vld [vmem:[%s2140_s25 + $0x110] sm:$0xff]  ;;  %v2039_v26 = vmov 0.0  }
  0x27   : > { %950 = vst.msk [vmem:[#allocation2] sm:$0xff] %vm285_vm0, %v2039_v26 }
  0x28   : > { %1768 = vmatmul.msk.f32.gmra.mxu2 %vm285_vm0, %v2189_v17  ;;  %1776 = vmatmul.msk.f32.gmra.mxu3 %vm285_vm0, %v2192_v18  ;;  %v697_v56 = vsel %vm424_vm1, %v695_v51, %v696_v53  ;;  %953 = vst.msk [vmem:[#allocation2 + $0x10] sm:$0xff] %vm285_vm0, %v2039_v26 }
  0x29   : > { %1764 = vmatmul.msk.f32.gmra.mxu0 %vm285_vm0, %v2195_v19  ;;  %1772 = vmatmul.msk.f32.gmra.mxu1 %vm285_vm0, %v2198_v20  ;;  %955 = vst.msk [vmem:[#allocation2 + $0x20] sm:$0xff] %vm285_vm0, %v2039_v26 }
  0x2a   : > { %957 = vst.msk [vmem:[#allocation2 + $0x30] sm:$0xff] %vm285_vm0, %v2039_v26 }
  0x2b   : > { %959 = vst.msk [vmem:[#allocation2 + $0x40] sm:$0xff] %vm285_vm0, %v2039_v26 }
  0x2c   : > { %961 = vst.msk [vmem:[#allocation2 + $0x50] sm:$0xff] %vm285_vm0, %v2039_v26 }
  0x2d   : > { %963 = vst.msk [vmem:[#allocation2 + $0x60] sm:$0xff] %vm285_vm0, %v2039_v26 }
  0x2e   : > { %v980_v33 = vld [vmem:[#allocation2] sm:$0xff]  ;;  %965 = vst.msk [vmem:[#allocation2 + $0x70] sm:$0xff] %vm285_vm0, %v2039_v26 }
  0x2f   : > { %967 = vst.msk [vmem:[#allocation2 + $0x80] sm:$0xff] %vm285_vm0, %v2039_v26 }
  0x30   : > { %1769 = vmatmul.msk.f32.gmra.mxu2 %vm285_vm0, %v2209_v21  ;;  %1777 = vmatmul.msk.f32.gmra.mxu3 %vm285_vm0, %v2212_v22  ;;  %969 = vst.msk [vmem:[#allocation2 + $0x90] sm:$0xff] %vm285_vm0, %v2039_v26 }
  0x31   : > { %1765 = vmatmul.msk.f32.gmra.mxu0 %vm285_vm0, %v2216_v24  ;;  %1773 = vmatmul.msk.f32.gmra.mxu1 %vm285_vm0, %v2219_v25  ;;  %954 = vst.msk [vmem:[#allocation2 + $0x18] sm:$0x3] %vm951_vm2, %v2039_v26 }
  0x32   : > { %952 = vst.msk [vmem:[#allocation2 + $0x8] sm:$0x3] %vm951_vm2, %v2039_v26 }
  0x33   : > { %956 = vst.msk [vmem:[#allocation2 + $0x28] sm:$0x3] %vm951_vm2, %v2039_v26 }
  0x34   : > { %958 = vst.msk [vmem:[#allocation2 + $0x38] sm:$0x3] %vm951_vm2, %v2039_v26 }
  0x35   : > { %960 = vst.msk [vmem:[#allocation2 + $0x48] sm:$0x3] %vm951_vm2, %v2039_v26 }
  0x36   : > { %962 = vst.msk [vmem:[#allocation2 + $0x58] sm:$0x3] %vm951_vm2, %v2039_v26 }
  0x37   : > { %964 = vst.msk [vmem:[#allocation2 + $0x68] sm:$0x3] %vm951_vm2, %v2039_v26 }
  0x38   : > { %1779 = vmatmul.msk.f32.vlgmr.msrb.gmra.mxu2 %vm285_vm0, %v427_v32  ;;  %1788 = vmatmul.msk.f32.vlgmr.msrb.gmra.mxu3 %vm285_vm0, %v1737_v29  ;;  %v1747_v29 = vld [vmem:[%s2140_s25 + $0x170] sm:$0xff]  ;;  %v442_v32 = vsel %vm424_vm1, %v440_v27, %v441_v28  ;;  %966 = vst.msk [vmem:[#allocation2 + $0x78] sm:$0x3] %vm951_vm2, %v2039_v26 }
  0x39   : > { %1797 = vmatmul.msk.f32.vlgmr.msrb.gmra.mxu0 %vm285_vm0, %v1753_v34  ;;  %1806 = vmatmul.msk.f32.vlgmr.msrb.gmra.mxu1 %vm285_vm0, %v676_v35  ;;  %v689_v30 = vrot.slane %v1747_v29, 1  ;;  %v1758_v34 = vld [vmem:[%s2140_s25 + $0x200] sm:$0xff]  ;;  %968 = vst.msk [vmem:[#allocation2 + $0x88] sm:$0x3] %vm951_vm2, %v2039_v26 }
  0x3a   : > { %970 = vst.msk [vmem:[#allocation2 + $0x98] sm:$0x3] %vm951_vm2, %v2039_v26 }
  0x3b   : > { %v691_v35 = vsel %vm424_vm1, %v689_v30, %v690_v31  ;;  %v1000_v30 = vld [vmem:[%s2869_s3] sm:$0xff] }
  0x3c   : > { %1131 = vmatpush.msrb.mxu2 %v1000_v30 }
  0x40   : > { %1780 = vmatmul.msk.f32.gmra.mxu2 %vm285_vm0, %v2243_v42  ;;  %1789 = vmatmul.msk.f32.gmra.mxu3 %vm285_vm0, %v1739_v39  ;;  %v1749_v39 = vld [vmem:[%s2140_s25 + $0x180] sm:$0xff] }
  0x41   : > { %1798 = vmatmul.msk.f32.gmra.mxu0 %vm285_vm0, %v1754_v44  ;;  %1807 = vmatmul.msk.f32.gmra.mxu1 %vm285_vm0, %v679_v45  ;;  %v692_v40 = vrot.slane %v1749_v39, 1  ;;  %v243_v44 = vld [vmem:[%s2140_s25 + $0x78] sm:$0x1]  ;;  %v1759_v45 = vld [vmem:[%s2140_s25 + $0x210] sm:$0xff] }
  0x43   : > { %v694_v46 = vsel %vm424_vm1, %v692_v40, %v693_v41  ;;  %v1017_v40 = vrot.slane %v980_v33, 1  ;;  %v1158_v41 = vrot.slane %v980_v33, 2 }
  0x48   : > { %1781 = vmatmul.msk.f32.gmra.mxu2 %vm285_vm0, %v2257_v52  ;;  %1790 = vmatmul.msk.f32.gmra.mxu3 %vm285_vm0, %v1741_v49  ;;  %v447_v49 = vrot.slane %v243_v44, 1  ;;  %v981_v44 = vld [vmem:[#allocation2 + $0x8] sm:$0x3] }
  0x49   : > { %1799 = vmatmul.msk.f32.gmra.mxu0 %vm285_vm0, %v1755_v54  ;;  %1808 = vmatmul.msk.f32.gmra.mxu1 %vm285_vm0, %v682_v55  ;;  %v1760_v55 = vld [vmem:[%s2140_s25 + $0x220] sm:$0xff]  ;;  %v1018_v47 = vrot.slane %v981_v44, 1 }
  0x4a   : > { %v448_v54 = vsel %vm424_vm1, %v446_v48, %v447_v49 }
  0x4b   : > { %v1019_v53 = vsel %vm424_vm1, %v1017_v40, %v1018_v47 }
  0x50   : > { %1782 = vmatmul.msk.f32.gmra.mxu2 %vm285_vm0, %v2271_v62  ;;  %1791 = vmatmul.msk.f32.gmra.mxu3 %vm285_vm0, %v1743_v59 }
  0x51   : > { %1800 = vmatmul.msk.f32.gmra.mxu0 %vm285_vm0, %v1756_v0  ;;  %1809 = vmatmul.msk.f32.gmra.mxu1 %vm285_vm0, %v685_v1 }
  0x58   : > { %1783 = vmatmul.msk.f32.gmra.mxu2 %vm285_vm0, %v439_v12  ;;  %1792 = vmatmul.msk.f32.gmra.mxu3 %vm285_vm0, %v1745_v7 }
  0x59   : > { %1801 = vmatmul.msk.f32.gmra.mxu0 %vm285_vm0, %v1757_v16  ;;  %1810 = vmatmul.msk.f32.gmra.mxu1 %vm285_vm0, %v688_v23 }
  0x60   : > { %1784 = vmatmul.msk.f32.gmra.mxu2 %vm285_vm0, %v442_v32  ;;  %1793 = vmatmul.msk.f32.gmra.mxu3 %vm285_vm0, %v1747_v29 }
  0x61   : > { %1802 = vmatmul.msk.f32.gmra.mxu0 %vm285_vm0, %v1758_v34  ;;  %1811 = vmatmul.msk.f32.gmra.mxu1 %vm285_vm0, %v691_v35 }
  0x68   : > { %1785 = vmatmul.msk.f32.gmra.mxu2 %vm285_vm0, %v445_v43  ;;  %1794 = vmatmul.msk.f32.gmra.mxu3 %vm285_vm0, %v1749_v39 }
  0x69   : > { %1803 = vmatmul.msk.f32.gmra.mxu0 %vm285_vm0, %v1759_v45  ;;  %1812 = vmatmul.msk.f32.gmra.mxu1 %vm285_vm0, %v694_v46  ;;  %v1867_v45 = vld [vmem:[%s2869_s3 + $0x18] sm:$0xff]  ;;  %v1159_v46 = vrot.slane %v981_v44, 2 }
  0x6a   : > { %1269 = vmatpush.msrb.mxu0 %v1867_v45 }
  0x6b   : > { %v1160_v51 = vsel %vm1157_vm3, %v1158_v41, %v1159_v46 }
  0x70   : > { %1786 = vmatmul.msk.f32.gmra.mxu2 %vm285_vm0, %v448_v54  ;;  %1795 = vmatmul.msk.f32.gmra.mxu3 %vm285_vm0, %v1751_v50  ;;  %v1876_v50 = vld [vmem:[%s2869_s3 + $0x20] sm:$0xff] }
  0x71   : > { %1804 = vmatmul.msk.f32.gmra.mxu0 %vm285_vm0, %v1760_v55  ;;  %1813 = vmatmul.msk.f32.gmra.mxu1 %vm285_vm0, %v697_v56 }
  0x78   : > { %1815 = vmatmul.msk.f32.vlgmr.msra.gmra.mxu2 %vm285_vm0, %v2172_v14  ;;  %1824 = vmatmul.msk.f32.vlgmr.msra.gmra.mxu3 %vm285_vm0, %v2169_v13 }
  0x79   : > { %1833 = vmatmul.msk.f32.vlgmr.msra.gmra.mxu0 %vm285_vm0, %v2243_v42 }
  0x80   : > { %1816 = vmatmul.msk.f32.gmra.mxu2 %vm285_vm0, %v2198_v20  ;;  %1825 = vmatmul.msk.f32.gmra.mxu3 %vm285_vm0, %v2195_v19  ;;  %v245_v20 = vld [vmem:[%s2140_s25 + $0x88] sm:$0x1] }
  0x81   : > { %1834 = vmatmul.msk.f32.gmra.mxu0 %vm285_vm0, %v2257_v52 }
  0x88   : > { %1817 = vmatmul.msk.f32.gmra.mxu2 %vm285_vm0, %v2219_v25  ;;  %1826 = vmatmul.msk.f32.gmra.mxu3 %vm285_vm0, %v2216_v24  ;;  %v875_v24 = vrot.slane %v245_v20, 1  ;;  %v1841_v25 = vld [vmem:[%s2869_s3 + $0x8] sm:$0xff] }
  0x89   : > { %1835 = vmatmul.msk.f32.gmra.mxu0 %vm285_vm0, %v2271_v62  ;;  %1074 = vmatpush.msra.mxu1 %v1841_v25 }
  0x8a   : > { %1842 = vmatmul.msk.f32.vlgmr.msra.gmra.mxu1 %vm285_vm0, %v1019_v53 }
  0x8b   : > { %1326 = vmatpush.msrb.mxu1 %v1876_v50 }
  0x90   : > { %1818 = vmatmul.msk.f32.gmra.mxu2 %vm285_vm0, %v2146_v6  ;;  %1827 = vmatmul.msk.f32.gmra.mxu3 %vm285_vm0, %v2143_v5 }
  0x91   : > { %1836 = vmatmul.msk.f32.gmra.mxu0 %vm285_vm0, %v439_v12 }
  0x96   : > { %v2347_v13 = vpop.f32.mrf.mxu0  ;;  %v392_v0 = vpop.f32.mrf.mxu1 }
  0x98   : > { %1819 = vmatmul.msk.f32.gmra.mxu2 %vm285_vm0, %v2163_v11  ;;  %1828 = vmatmul.msk.f32.gmra.mxu3 %vm285_vm0, %v2160_v10 }
  0x99   : > { %1837 = vmatmul.msk.f32.gmra.mxu0 %vm285_vm0, %v442_v32  ;;  %v1858_v32 = vld [vmem:[%s2869_s3 + $0x10] sm:$0xff] }
  0x9a   : > { %1215 = vmatpush.msrb.mxu3 %v1858_v32 }
  0x9b   : > { %v2354_v14 = vpop.f32.mrf.mxu2  ;;  %v2356_v6 = vpop.f32.mrf.mxu3 }
  0x9e   : > { %v2358_v19 = vpop.f32.mrf.mxu0  ;;  %v2412_v8 = vpop.f32.mrf.mxu1 }
  0x9f   : > { %v396_v20 = vadd.f32 %v2412_v8, %v2358_v19 }
  0xa0   : > { %1820 = vmatmul.msk.f32.gmra.mxu2 %vm285_vm0, %v2192_v18  ;;  %1829 = vmatmul.msk.f32.gmra.mxu3 %vm285_vm0, %v2189_v17  ;;  %v244_v18 = vld [vmem:[%s2140_s25 + $0x80] sm:$0xff] }
  0xa1   : > { %1838 = vmatmul.msk.f32.gmra.mxu0 %vm285_vm0, %v445_v43  ;;  %v874_v17 = vrot.slane %v244_v18, 1  ;;  %v393_v43 = vadd.f32 %v392_v0, %v2347_v13 }
  0xa3   : > { %v2365_v5 = vpop.f32.mrf.mxu2  ;;  %v2367_v10 = vpop.f32.mrf.mxu3 }
  0xa6   : > { %v2369_v11 = vpop.f32.mrf.mxu0  ;;  %v2420_v16 = vpop.f32.mrf.mxu1 }
  0xa8   : > { %1821 = vmatmul.msk.f32.gmra.mxu2 %vm285_vm0, %v2212_v22  ;;  %1830 = vmatmul.msk.f32.gmra.mxu3 %vm285_vm0, %v2209_v21  ;;  %v876_v22 = vsel %vm424_vm1, %v874_v17, %v875_v24 }
  0xa9   : > { %1839 = vmatmul.msk.f32.gmra.mxu0 %vm285_vm0, %v448_v54 }
  0xab   : > { %v2381_v42 = vpop.f32.mrf.mxu2  ;;  %v2383_v52 = vpop.f32.mrf.mxu3 }
  0xae   : > { %v2386_v58 = vpop.f32.mrf.mxu0  ;;  %v2439_v31 = vpop.f32.mrf.mxu1 }
  0xb0   : > { %1822 = vmatmul.msk.f32.gmra.mxu2 %vm285_vm0, %v244_v18  ;;  %1831 = vmatmul.msk.f32.gmra.mxu3 %vm285_vm0, %v1736_v57 }
  0xb1   : > { %1840 = vmatmul.msk.f32.gmra.mxu0 %vm285_vm0, %v876_v22 }
  0xb3   : > { %v2392_v21 = vpop.f32.mrf.mxu2  ;;  %v2394_v59 = vpop.f32.mrf.mxu3 }
  0xb6   : > { %v2396_v60 = vpop.f32.mrf.mxu0  ;;  %v733_v37 = vpop.f32.mrf.mxu1 }
  0xb8   : > { %1850 = vmatmul.msk.f32.vlgmr.msrb.gmra.mxu2 %vm285_vm0, %v980_v33  ;;  %1859 = vmatmul.msk.f32.vlgmr.msrb.gmra.mxu3 %vm285_vm0, %v1160_v51 }
  0xbb   : > { %v484_v61 = vpop.f32.mrf.mxu2  ;;  %v2398_v62 = vpop.f32.mrf.mxu3 }
  0xbc   : > { %v508_v48 = vadd.f32 %v484_v61, %v393_v43 }
  0xbe   : > { %v2400_v63 = vpop.f32.mrf.mxu0  ;;  %v583_v54 = vadd.f32 %v2398_v62, %v508_v48  ;;  %v736_v55 = vpop.f32.mrf.mxu1  ;;  %v399_v62 = vadd.f32 %v2420_v16, %v2369_v11  ;;  %v402_v11 = vadd.f32 %v2439_v31, %v2386_v58  ;;  %v405_v48 = vadd.f32 %v2356_v6, %v2354_v14 }
  0xc0   : > { %v658_v18 = vadd.f32 %v2396_v60, %v583_v54  ;;  %v2499_v60 = vld [vmem:[%s2868_s2] ss:$0 sm:$0xff] }
  0xc2   : > { %v757_v25 = vadd.f32 %v733_v37, %v658_v18 }
  0xc3   : > { %v2402_v1 = vpop.f32.mrf.mxu2  ;;  %v2404_v2 = vpop.f32.mrf.mxu3 }
  0xc4   : > { %v509_v17 = vadd.f32 %v2402_v1, %v396_v20 }
  0xc6   : > { %v2406_v3 = vpop.f32.mrf.mxu0  ;;  %v584_v57 = vadd.f32 %v2404_v2, %v509_v17  ;;  %v739_v0 = vpop.f32.mrf.mxu1 }
  0xc8   : > { %v659_v30 = vadd.f32 %v2400_v63, %v584_v57 }
  0xca   : > { %v758_v2 = vadd.f32 %v736_v55, %v659_v30 }
  0xcb   : > { %v2408_v4 = vpop.f32.mrf.mxu2  ;;  %v2410_v7 = vpop.f32.mrf.mxu3 }
  0xcc   : > { %v510_v32 = vadd.f32 %v2408_v4, %v399_v62 }
  0xce   : > { %v2414_v9 = vpop.f32.mrf.mxu0  ;;  %v585_v33 = vadd.f32 %v2410_v7, %v510_v32  ;;  %v742_v44 = vpop.f32.mrf.mxu1 }
  0xd0   : > { %v660_v43 = vadd.f32 %v2406_v3, %v585_v33 }
  0xd2   : > { %v759_v58 = vadd.f32 %v739_v0, %v660_v43  ;;  %v408_v0 = vadd.f32 %v2367_v10, %v2365_v5 }
  0xd3   : > { %v2416_v12 = vpop.f32.mrf.mxu2  ;;  %v2418_v15 = vpop.f32.mrf.mxu3 }
  0xd4   : > { %v511_v41 = vadd.f32 %v2416_v12, %v402_v11 }
  0xd6   : > { %v2422_v23 = vpop.f32.mrf.mxu0  ;;  %v586_v47 = vadd.f32 %v2418_v15, %v511_v41 }
  0xd8   : > { %v661_v3 = vadd.f32 %v2414_v9, %v586_v47 }
  0xdb   : > { %v2425_v27 = vpop.f32.mrf.mxu2  ;;  %v2427_v28 = vpop.f32.mrf.mxu3 }
  0xdc   : > { %v512_v54 = vadd.f32 %v2425_v27, %v405_v48 }
  0xde   : > { %v2432_v29 = vpop.f32.mrf.mxu0  ;;  %v587_v27 = vadd.f32 %v2427_v28, %v512_v54 }
  0xe3   : > { %v2448_v34 = vpop.f32.mrf.mxu2  ;;  %v2450_v35 = vpop.f32.mrf.mxu3 }
  0xe6   : > { %v2455_v36 = vpop.f32.mrf.mxu0 }
  0xeb   : > { %v2462_v38 = vpop.f32.mrf.mxu2  ;;  %v2464_v39 = vpop.f32.mrf.mxu3 }
  0xee   : > { %v2473_v49 = vpop.f32.mrf.mxu0 }
  0xf3   : > { %v2483_v56 = vpop.f32.mrf.mxu2  ;;  %v2485_v13 = vpop.f32.mrf.mxu3 }
  0xf6   : > { %v898_v24 = vpop.f32.mrf.mxu0 }
  0xfb   : > { %v787_v22 = vpop.f32.mrf.mxu2  ;;  %v841_v61 = vpop.f32.mrf.mxu3 }
  0xfc   : > { %v811_v26 = vadd.f32 %v787_v22, %v757_v25  ;;  %v745_v25 = vpop.f32.mrf.mxu1 }
  0xfe   : > { %v865_v19 = vadd.f32 %v841_v61, %v811_v26  ;;  %v901_v1 = vpop.f32.mrf.mxu0  ;;  %v760_v61 = vadd.f32 %v742_v44, %v661_v3  ;;  %v411_v44 = vadd.f32 %v2383_v52, %v2381_v42 }
 0x100   : > { %v922_v8 = vadd.f32 %v898_v24, %v865_v19  ;;  %v662_v19 = vadd.f32 %v2422_v23, %v587_v27 }
 0x102   : > { %v934_v37 = vadd.f32 %v2499_v60, %v922_v8 }
 0x103   : > { %v790_v16 = vpop.f32.mrf.mxu2  ;;  %v844_v63 = vpop.f32.mrf.mxu3 }
 0x104   : > { %v812_v40 = vadd.f32 %v790_v16, %v758_v2  ;;  %1603 = vrot.lane.b32.xlu0 %v934_v37, %s2040_s8  ;;  %v942_v4 = vmax.f32 %v934_v37, 0.0  ;;  %v748_v41 = vpop.f32.mrf.mxu1 }
 0x106   : > { %972 = vst.msk [vmem:[#allocation2 + $0x11] sm:$0xff] %vm285_vm0, %v942_v4  ;;  %v866_v7 = vadd.f32 %v844_v63, %v812_v40  ;;  %v904_v45 = vpop.f32.mrf.mxu0  ;;  %v761_v4 = vadd.f32 %v745_v25, %v662_v19 }
 0x108   : > { %v923_v46 = vadd.f32 %v901_v1, %v866_v7  ;;  %v513_v1 = vadd.f32 %v2448_v34, %v408_v0 }
 0x10a   : > { %v935_v31 = vadd.f32 %v2499_v60, %v923_v46  ;;  %v588_v63 = vadd.f32 %v2450_v35, %v513_v1 }
 0x10b   : > { %v793_v50 = vpop.f32.mrf.mxu2  ;;  %v847_v51 = vpop.f32.mrf.mxu3 }
 0x10c   : > { %v943_v53 = vmax.f32 %v935_v31, 0.0  ;;  %v813_v12 = vadd.f32 %v793_v50, %v759_v58  ;;  %1605 = vrot.lane.b32.xlu0 %v935_v31, %s2040_s8  ;;  %v663_v47 = vadd.f32 %v2432_v29, %v588_v63  ;;  %v514_v58 = vadd.f32 %v2462_v38, %v411_v44  ;;  %v1885_v29 = vld [vmem:[%s2869_s3 + $0x28] sm:$0xff]  ;;  %v1894_v38 = vld [vmem:[%s2869_s3 + $0x30] sm:$0xff] }
 0x10d   : > { %v982_v55 = vld [vmem:[#allocation2 + $0x10] sm:$0xff]  ;;  %v983_v20 = vld [vmem:[#allocation2 + $0x18] sm:$0x3]  ;;  %1382 = vmatpush.msra.mxu2 %v1885_v29  ;;  %1436 = vmatpush.msra.mxu3 %v1894_v38 }
 0x10e   : > { %973 = vst.msk [vmem:[#allocation2 + $0x21] sm:$0xff] %vm285_vm0, %v943_v53  ;;  %v867_v15 = vadd.f32 %v847_v51, %v813_v12  ;;  %1851 = vmatmul.msk.f32.gmra.mxu2 %vm285_vm0, %v982_v55  ;;  %1868 = vmatmul.msk.f32.vlgmr.msrb.gmra.mxu0 %vm285_vm0, %v982_v55  ;;  %v1020_v14 = vrot.slane %v982_v55, 1  ;;  %v1021_v6 = vrot.slane %v983_v20, 1  ;;  %v1161_v18 = vrot.slane %v982_v55, 2  ;;  %v907_v17 = vpop.f32.mrf.mxu0 }
 0x10f   : > { %v1162_v24 = vrot.slane %v983_v20, 2  ;;  %v589_v55 = vadd.f32 %v2464_v39, %v514_v58 }
 0x110   : > { %v924_v57 = vadd.f32 %v904_v45, %v867_v15  ;;  %v2520_v9 = vsel %vm424_vm1, %v1020_v14, %v1021_v6  ;;  %v762_v15 = vadd.f32 %v748_v41, %v663_v47  ;;  %v414_v6 = vadd.f32 %v2394_v59, %v2392_v21 }
 0x111   : > { %1843 = vmatmul.msk.f32.gmra.mxu1 %vm285_vm0, %v2520_v9  ;;  %v2526_v22 = vsel %vm1157_vm3, %v1161_v18, %v1162_v24  ;;  %v664_v25 = vadd.f32 %v2455_v36, %v589_v55 }
 0x112   : > { %1860 = vmatmul.msk.f32.gmra.mxu3 %vm285_vm0, %v2526_v22  ;;  %v936_v62 = vadd.f32 %v2499_v60, %v924_v57  ;;  %v751_v57 = vpop.f32.mrf.mxu1  ;;  %v515_v27 = vadd.f32 %v2483_v56, %v414_v6  ;;  %v1903_v56 = vld [vmem:[%s2869_s3 + $0x38] sm:$0xff] }
 0x113   : > { %v796_v26 = vpop.f32.mrf.mxu2  ;;  %v850_v30 = vpop.f32.mrf.mxu3  ;;  %1493 = vmatpush.msra.mxu0 %v1903_v56  ;;  %v763_v1 = vadd.f32 %v751_v57, %v664_v25  ;;  %v998_v56 = vld [vmem:[#allocation2 + $0x90] sm:$0xff] }
 0x114   : > { %v814_v32 = vadd.f32 %v796_v26, %v760_v61  ;;  %1607 = vrot.lane.b32.xlu1 %v936_v62, %s2040_s8  ;;  %v944_v28 = vmax.f32 %v936_v62, 0.0 }
 0x115   : > { %v2536_v8 = vld [vmem:[#allocation2 + $0x20] sm:$0xff]  ;;  %v985_v2 = vld [vmem:[#allocation2 + $0x28] sm:$0x3] }
 0x116   : > { %974 = vst.msk [vmem:[#allocation2 + $0x31] sm:$0xff] %vm285_vm0, %v944_v28  ;;  %v868_v33 = vadd.f32 %v850_v30, %v814_v32  ;;  %1852 = vmatmul.msk.f32.gmra.mxu2 %vm285_vm0, %v2536_v8  ;;  %1869 = vmatmul.msk.f32.gmra.mxu0 %vm285_vm0, %v2536_v8  ;;  %v1023_v5 = vrot.slane %v2536_v8, 1  ;;  %v1024_v10 = vrot.slane %v985_v2, 1  ;;  %v1164_v37 = vrot.slane %v2536_v8, 2  ;;  %v910_v23 = vpop.f32.mrf.mxu0 }
 0x117   : > { %v1165_v11 = vrot.slane %v985_v2, 2  ;;  %v590_v28 = vadd.f32 %v2485_v13, %v515_v27 }
 0x118   : > { %v925_v34 = vadd.f32 %v907_v17, %v868_v33  ;;  %v2546_v16 = vsel %vm424_vm1, %v1023_v5, %v1024_v10  ;;  %v1912_v5 = vld [vmem:[%s2869_s3 + $0x40] sm:$0xff] }
 0x119   : > { %1844 = vmatmul.msk.f32.gmra.mxu1 %vm285_vm0, %v2546_v16  ;;  %v2552_v40 = vsel %vm1157_vm3, %v1164_v37, %v1165_v11  ;;  %v665_v11 = vadd.f32 %v2473_v49, %v590_v28 }
 0x11a   : > { %v937_v43 = vadd.f32 %v2499_v60, %v925_v34  ;;  %1861 = vmatmul.msk.f32.gmra.mxu3 %vm285_vm0, %v2552_v40  ;;  %1549 = vmatpush.msra.mxu1 %v1912_v5 }
 0x11b   : > { %v799_v7 = vpop.f32.mrf.mxu2  ;;  %v853_v45 = vpop.f32.mrf.mxu3 }
 0x11c   : > { %v945_v46 = vmax.f32 %v937_v43, 0.0  ;;  %v815_v35 = vadd.f32 %v799_v7, %v761_v4  ;;  %1609 = vrot.lane.b32.xlu1 %v937_v43, %s2040_s8  ;;  %v754_v7 = vpop.f32.mrf.mxu1 }
 0x11d   : > { %v2562_v31 = vld [vmem:[#allocation2 + $0x30] sm:$0xff]  ;;  %v987_v48 = vld [vmem:[#allocation2 + $0x38] sm:$0x3]  ;;  %v764_v47 = vadd.f32 %v754_v7, %v665_v11 }
 0x11e   : > { %975 = vst.msk [vmem:[#allocation2 + $0x41] sm:$0xff] %vm285_vm0, %v945_v46  ;;  %v869_v50 = vadd.f32 %v853_v45, %v815_v35  ;;  %1853 = vmatmul.msk.f32.gmra.mxu2 %vm285_vm0, %v2562_v31  ;;  %1870 = vmatmul.msk.f32.gmra.mxu0 %vm285_vm0, %v2562_v31  ;;  %v1026_v42 = vrot.slane %v2562_v31, 1  ;;  %v1027_v52 = vrot.slane %v987_v48, 1  ;;  %v1167_v51 = vrot.slane %v2562_v31, 2  ;;  %v913_v54 = vpop.f32.mrf.mxu0 }
 0x11f   : > { %v1168_v53 = vrot.slane %v987_v48, 2 }
 0x120   : > { %v926_v12 = vadd.f32 %v910_v23, %v869_v50  ;;  %v2578_v3 = vsel %vm424_vm1, %v1026_v42, %v1027_v52 }
 0x121   : > { %1845 = vmatmul.msk.f32.gmra.mxu1 %vm285_vm0, %v2578_v3  ;;  %v2584_v20 = vsel %vm1157_vm3, %v1167_v51, %v1168_v53 }
 0x122   : > { %1862 = vmatmul.msk.f32.gmra.mxu3 %vm285_vm0, %v2584_v20  ;;  %v938_v14 = vadd.f32 %v2499_v60, %v926_v12 }
 0x123   : > { %v802_v18 = vpop.f32.mrf.mxu2  ;;  %v856_v17 = vpop.f32.mrf.mxu3 }
 0x124   : > { %v816_v24 = vadd.f32 %v802_v18, %v762_v15  ;;  %1611 = vrot.lane.b32.xlu2 %v938_v14, %s2040_s8  ;;  %v946_v39 = vmax.f32 %v938_v14, 0.0  ;;  %v1076_v28 = vpop.f32.mrf.mxu1 }
 0x125   : > { %v2594_v61 = vld [vmem:[#allocation2 + $0x40] sm:$0xff]  ;;  %v989_v62 = vld [vmem:[#allocation2 + $0x48] sm:$0x3] }
 0x126   : > { %976 = vst.msk [vmem:[#allocation2 + $0x51] sm:$0xff] %vm285_vm0, %v946_v39  ;;  %v870_v0 = vadd.f32 %v856_v17, %v816_v24  ;;  %1854 = vmatmul.msk.f32.gmra.mxu2 %vm285_vm0, %v2594_v61  ;;  %1871 = vmatmul.msk.f32.gmra.mxu0 %vm285_vm0, %v2594_v61  ;;  %v1029_v21 = vrot.slane %v2594_v61, 1  ;;  %v1030_v59 = vrot.slane %v989_v62, 1  ;;  %v1170_v36 = vrot.slane %v2594_v61, 2  ;;  %v916_v33 = vpop.f32.mrf.mxu0 }
 0x127   : > { %v1171_v26 = vrot.slane %v989_v62, 2 }
 0x128   : > { %v927_v30 = vadd.f32 %v913_v54, %v870_v0  ;;  %v2607_v32 = vsel %vm424_vm1, %v1029_v21, %v1030_v59 }
 0x129   : > { %1846 = vmatmul.msk.f32.gmra.mxu1 %vm285_vm0, %v2607_v32  ;;  %v2613_v19 = vsel %vm1157_vm3, %v1170_v36, %v1171_v26  ;;  %v1471_v26 = vrot.slane %v998_v56, 1 }
 0x12a   : > { %v939_v2 = vadd.f32 %v2499_v60, %v927_v30  ;;  %1863 = vmatmul.msk.f32.gmra.mxu3 %vm285_vm0, %v2613_v19 }
 0x12b   : > { %v805_v10 = vpop.f32.mrf.mxu2  ;;  %v859_v37 = vpop.f32.mrf.mxu3 }
 0x12c   : > { %v947_v13 = vmax.f32 %v939_v2, 0.0  ;;  %v817_v23 = vadd.f32 %v805_v10, %v763_v1  ;;  %1613 = vrot.lane.b32.xlu2 %v939_v2, %s2040_s8 }
 0x12d   : > { %v2623_v34 = vld [vmem:[#allocation2 + $0x50] sm:$0xff]  ;;  %v991_v63 = vld [vmem:[#allocation2 + $0x58] sm:$0x3] }
 0x12e   : > { %977 = vst.msk [vmem:[#allocation2 + $0x61] sm:$0xff] %vm285_vm0, %v947_v13  ;;  %v871_v4 = vadd.f32 %v859_v37, %v817_v23  ;;  %1855 = vmatmul.msk.f32.gmra.mxu2 %vm285_vm0, %v2623_v34  ;;  %1872 = vmatmul.msk.f32.gmra.mxu0 %vm285_vm0, %v2623_v34  ;;  %v1032_v41 = vrot.slane %v2623_v34, 1  ;;  %v1033_v43 = vrot.slane %v991_v63, 1  ;;  %v1173_v44 = vrot.slane %v2623_v34, 2  ;;  %v919_v29 = vpop.f32.mrf.mxu0 }
 0x12f   : > { %v1174_v45 = vrot.slane %v991_v63, 2 }
 0x130   : > { %v928_v49 = vadd.f32 %v916_v33, %v871_v4  ;;  %v1034_v46 = vsel %vm424_vm1, %v1032_v41, %v1033_v43  ;;  %v1527_v41 = vrot.slane %v998_v56, 2 }
 0x131   : > { %1847 = vmatmul.msk.f32.gmra.mxu1 %vm285_vm0, %v1034_v46  ;;  %v2635_v35 = vsel %vm1157_vm3, %v1173_v44, %v1174_v45 }
 0x132   : > { %v940_v58 = vadd.f32 %v2499_v60, %v928_v49  ;;  %1864 = vmatmul.msk.f32.gmra.mxu3 %vm285_vm0, %v2635_v35 }
 0x133   : > { %v808_v48 = vpop.f32.mrf.mxu2  ;;  %v862_v50 = vpop.f32.mrf.mxu3 }
 0x134   : > { %v948_v42 = vmax.f32 %v940_v58, 0.0  ;;  %v818_v52 = vadd.f32 %v808_v48, %v764_v47  ;;  %1615 = vrot.lane.b32.xlu0 %v940_v58, %s2040_s8 }
 0x135   : > { %v992_v51 = vld [vmem:[#allocation2 + $0x60] sm:$0xff]  ;;  %v993_v38 = vld [vmem:[#allocation2 + $0x68] sm:$0x3] }
 0x136   : > { %978 = vst.msk [vmem:[#allocation2 + $0x71] sm:$0xff] %vm285_vm0, %v948_v42  ;;  %v872_v53 = vadd.f32 %v862_v50, %v818_v52  ;;  %1856 = vmatmul.msk.f32.gmra.mxu2 %vm285_vm0, %v992_v51  ;;  %1873 = vmatmul.msk.f32.gmra.mxu0 %vm285_vm0, %v992_v51  ;;  %v1035_v12 = vrot.slane %v992_v51, 1  ;;  %v1036_v54 = vrot.slane %v993_v38, 1  ;;  %v1176_v55 = vrot.slane %v992_v51, 2 }
 0x137   : > { %v1177_v15 = vrot.slane %v993_v38, 2 }
 0x138   : > { %v929_v14 = vadd.f32 %v919_v29, %v872_v53  ;;  %v1037_v6 = vsel %vm424_vm1, %v1035_v12, %v1036_v54 }
 0x139   : > { %1848 = vmatmul.msk.f32.gmra.mxu1 %vm285_vm0, %v1037_v6  ;;  %v2647_v18 = vsel %vm1157_vm3, %v1176_v55, %v1177_v15 }
 0x13a   : > { %v941_v17 = vadd.f32 %v2499_v60, %v929_v14  ;;  %1865 = vmatmul.msk.f32.gmra.mxu3 %vm285_vm0, %v2647_v18 }
 0x13b   : > { %v1133_v33 = vpop.f32.mrf.mxu2  ;;  %v1217_v10 = vpop.f32.mrf.mxu3 }
 0x13c   : > { %v949_v24 = vmax.f32 %v941_v17, 0.0  ;;  %1617 = vrot.lane.b32.xlu1 %v941_v17, %s2040_s8 }
 0x13d   : > { %v994_v39 = vld [vmem:[#allocation2 + $0x70] sm:$0xff]  ;;  %v995_v25 = vld [vmem:[#allocation2 + $0x78] sm:$0x3] }
 0x13e   : > { %979 = vst.msk [vmem:[#allocation2 + $0x81] sm:$0xff] %vm285_vm0, %v949_v24  ;;  %1857 = vmatmul.msk.f32.gmra.mxu2 %vm285_vm0, %v994_v39  ;;  %1874 = vmatmul.msk.f32.gmra.mxu0 %vm285_vm0, %v994_v39  ;;  %v1038_v57 = vrot.slane %v994_v39, 1  ;;  %v1039_v27 = vrot.slane %v995_v25, 1  ;;  %v1179_v62 = vrot.slane %v994_v39, 2  ;;  %v1180_v0 = vrot.slane %v995_v25, 2 }
 0x13f   : > { %v1134_v24 = vadd.f32 %v1133_v33, %v1076_v28 }
 0x140   : > { %v1040_v60 = vsel %vm424_vm1, %v1038_v57, %v1039_v27  ;;  %v2658_v21 = vsel %vm1157_vm3, %v1179_v62, %v1180_v0 }
 0x141   : > { %1849 = vmatmul.msk.f32.gmra.mxu1 %vm285_vm0, %v1040_v60  ;;  %v1241_v25 = vadd.f32 %v1217_v10, %v1134_v24 }
 0x142   : > { %1866 = vmatmul.msk.f32.gmra.mxu3 %vm285_vm0, %v2658_v21 }
 0x145   : > { %v996_v59 = vld [vmem:[#allocation2 + $0x80] sm:$0xff] }
 0x146   : > { %1875 = vmatmul.msk.f32.gmra.mxu0 %vm285_vm0, %v996_v59  ;;  %1886 = vmatmul.msk.f32.vlgmr.msra.gmra.mxu2 %vm285_vm0, %v2526_v22  ;;  %v1304_v22 = vrot.slane %v996_v59, 1 }
 0x149   : > { %1877 = vmatmul.msk.f32.vlgmr.msrb.gmra.mxu1 %vm285_vm0, %v2520_v9  ;;  %v997_v9 = vld [vmem:[#allocation2 + $0x88] sm:$0x3] }
 0x14a   : > { %1895 = vmatmul.msk.f32.vlgmr.msra.gmra.mxu3 %vm285_vm0, %v2536_v8  ;;  %v1360_v8 = vrot.slane %v996_v59, 2 }
 0x14e   : > { %1887 = vmatmul.msk.f32.gmra.mxu2 %vm285_vm0, %v2552_v40  ;;  %1904 = vmatmul.msk.f32.vlgmr.msra.gmra.mxu0 %vm285_vm0, %v2546_v16 }
 0x151   : > { %1878 = vmatmul.msk.f32.gmra.mxu1 %vm285_vm0, %v2546_v16  ;;  %v1361_v16 = vrot.slane %v997_v9, 2 }
 0x152   : > { %1896 = vmatmul.msk.f32.gmra.mxu3 %vm285_vm0, %v2562_v31  ;;  %v1305_v31 = vrot.slane %v997_v9, 1 }
 0x154   : > { %v1306_v36 = vsel %vm424_vm1, %v1304_v22, %v1305_v31 }
 0x156   : > { %1888 = vmatmul.msk.f32.gmra.mxu2 %vm285_vm0, %v2584_v20  ;;  %1905 = vmatmul.msk.f32.gmra.mxu0 %vm285_vm0, %v2578_v3 }
 0x159   : > { %1879 = vmatmul.msk.f32.gmra.mxu1 %vm285_vm0, %v2578_v3  ;;  %v999_v3 = vld [vmem:[#allocation2 + $0x98] sm:$0x3] }
 0x15a   : > { %1897 = vmatmul.msk.f32.gmra.mxu3 %vm285_vm0, %v2594_v61  ;;  %v1362_v61 = vsel %vm1157_vm3, %v1360_v8, %v1361_v16  ;;  %v1472_v30 = vrot.slane %v999_v3, 1  ;;  %v1528_v44 = vrot.slane %v999_v3, 2 }
 0x15c   : > { %v1529_v49 = vsel %vm1157_vm3, %v1527_v41, %v1528_v44 }
 0x15e   : > { %1889 = vmatmul.msk.f32.gmra.mxu2 %vm285_vm0, %v2613_v19  ;;  %1906 = vmatmul.msk.f32.gmra.mxu0 %vm285_vm0, %v2607_v32 }
 0x161   : > { %1880 = vmatmul.msk.f32.gmra.mxu1 %vm285_vm0, %v2607_v32  ;;  %v1473_v32 = vsel %vm424_vm1, %v1471_v26, %v1472_v30 }
 0x162   : > { %1898 = vmatmul.msk.f32.gmra.mxu3 %vm285_vm0, %v2623_v34 }
 0x166   : > { %1890 = vmatmul.msk.f32.gmra.mxu2 %vm285_vm0, %v2635_v35  ;;  %1907 = vmatmul.msk.f32.gmra.mxu0 %vm285_vm0, %v1034_v46 }
 0x169   : > { %1881 = vmatmul.msk.f32.gmra.mxu1 %vm285_vm0, %v1034_v46 }
 0x16a   : > { %1899 = vmatmul.msk.f32.gmra.mxu3 %vm285_vm0, %v992_v51 }
 0x16e   : > { %1891 = vmatmul.msk.f32.gmra.mxu2 %vm285_vm0, %v2647_v18  ;;  %1908 = vmatmul.msk.f32.gmra.mxu0 %vm285_vm0, %v1037_v6 }
 0x171   : > { %1882 = vmatmul.msk.f32.gmra.mxu1 %vm285_vm0, %v1037_v6 }
 0x172   : > { %1900 = vmatmul.msk.f32.gmra.mxu3 %vm285_vm0, %v994_v39 }
 0x176   : > { %1892 = vmatmul.msk.f32.gmra.mxu2 %vm285_vm0, %v2658_v21  ;;  %1909 = vmatmul.msk.f32.gmra.mxu0 %vm285_vm0, %v1040_v60 }
 0x179   : > { %1883 = vmatmul.msk.f32.gmra.mxu1 %vm285_vm0, %v1040_v60 }
 0x17a   : > { %1901 = vmatmul.msk.f32.gmra.mxu3 %vm285_vm0, %v996_v59 }
 0x17e   : > { %1893 = vmatmul.msk.f32.gmra.mxu2 %vm285_vm0, %v1362_v61  ;;  %1910 = vmatmul.msk.f32.gmra.mxu0 %vm285_vm0, %v1306_v36 }
 0x181   : > { %1884 = vmatmul.msk.f32.gmra.mxu1 %vm285_vm0, %v1306_v36 }
 0x182   : > { %1902 = vmatmul.msk.f32.gmra.mxu3 %vm285_vm0, %v998_v56 }
 0x186   : > { %1911 = vmatmul.msk.f32.gmra.mxu0 %vm285_vm0, %v1473_v32 }
 0x189   : > { %1913 = vmatmul.msk.f32.vlgmr.msra.gmra.mxu1 %vm285_vm0, %v2552_v40 }
 0x18b   : > { %v1271_v37 = vpop.f32.mrf.mxu0 }
 0x18c   : > { %v1295_v0 = vadd.f32 %v1271_v37, %v1241_v25 }
 0x18e   : > { %v1079_v1 = vpop.f32.mrf.mxu1 }
 0x191   : > { %1914 = vmatmul.msk.f32.gmra.mxu1 %vm285_vm0, %v2584_v20  ;;  %v1136_v13 = vpop.f32.mrf.mxu2 }
 0x192   : > { %v1137_v60 = vadd.f32 %v1136_v13, %v1079_v1  ;;  %v2780_v1 = vld [vmem:[%s2870_s4] ss:$0 sm:$0xff]  ;;  %v1604_v13 = vpop.permute.xlu0 %1603 }
 0x193   : > { %v1274_v11 = vpop.f32.mrf.mxu0 }
 0x195   : > { %v1220_v40 = vpop.f32.mrf.mxu3 }
 0x196   : > { %v1082_v2 = vpop.f32.mrf.mxu1  ;;  %v1242_v9 = vadd.f32 %v1220_v40, %v1137_v60 }
 0x198   : > { %v1296_v31 = vadd.f32 %v1274_v11, %v1242_v9 }
 0x199   : > { %1915 = vmatmul.msk.f32.gmra.mxu1 %vm285_vm0, %v2613_v19  ;;  %v1139_v34 = vpop.f32.mrf.mxu2 }
 0x19a   : > { %v1140_v16 = vadd.f32 %v1139_v34, %v1082_v2  ;;  %v1606_v25 = vpop.permute.xlu0 %1605 }
 0x19b   : > { %v1277_v4 = vpop.f32.mrf.mxu0 }
 0x19d   : > { %v1223_v19 = vpop.f32.mrf.mxu3 }
 0x19e   : > { %v2723_v5 = vpop.f32.mrf.mxu1  ;;  %v1243_v26 = vadd.f32 %v1223_v19, %v1140_v16 }
 0x1a0   : > { %v1297_v37 = vadd.f32 %v1277_v4, %v1243_v26 }
 0x1a1   : > { %1916 = vmatmul.msk.f32.gmra.mxu1 %vm285_vm0, %v2635_v35  ;;  %v1142_v43 = vpop.f32.mrf.mxu2 }
 0x1a2   : > { %v1143_v10 = vadd.f32 %v1142_v43, %v2723_v5 }
 0x1a3   : > { %v2742_v46 = vpop.f32.mrf.mxu0 }
 0x1a5   : > { %v1226_v7 = vpop.f32.mrf.mxu3 }
 0x1a6   : > { %v2727_v23 = vpop.f32.mrf.mxu1  ;;  %v1244_v44 = vadd.f32 %v1226_v7, %v1143_v10 }
 0x1a9   : > { %1917 = vmatmul.msk.f32.gmra.mxu1 %vm285_vm0, %v2647_v18  ;;  %v2744_v35 = vpop.f32.mrf.mxu2 }
 0x1ab   : > { %v2748_v48 = vpop.f32.mrf.mxu0 }
 0x1ad   : > { %v2746_v58 = vpop.f32.mrf.mxu3 }
 0x1ae   : > { %v2731_v20 = vpop.f32.mrf.mxu1 }
 0x1b1   : > { %1918 = vmatmul.msk.f32.gmra.mxu1 %vm285_vm0, %v2658_v21  ;;  %v2750_v50 = vpop.f32.mrf.mxu2 }
 0x1b3   : > { %v2754_v29 = vpop.f32.mrf.mxu0 }
 0x1b5   : > { %v2752_v52 = vpop.f32.mrf.mxu3 }
 0x1b6   : > { %v2735_v63 = vpop.f32.mrf.mxu1 }
 0x1b9   : > { %1919 = vmatmul.msk.f32.gmra.mxu1 %vm285_vm0, %v1362_v61  ;;  %v2756_v38 = vpop.f32.mrf.mxu2 }
 0x1bb   : > { %v2760_v54 = vpop.f32.mrf.mxu0 }
 0x1bd   : > { %v2758_v53 = vpop.f32.mrf.mxu3 }
 0x1be   : > { %v2738_v45 = vpop.f32.mrf.mxu1 }
 0x1c1   : > { %1920 = vmatmul.msk.f32.gmra.mxu1 %vm285_vm0, %v1529_v49  ;;  %v2762_v55 = vpop.f32.mrf.mxu2 }
 0x1c3   : > { %v2768_v6 = vpop.f32.mrf.mxu0 }
 0x1c5   : > { %v2764_v15 = vpop.f32.mrf.mxu3 }
 0x1c6   : > { %v1328_v47 = vpop.f32.mrf.mxu1 }
 0x1c7   : > { %v1352_v21 = vadd.f32 %v1328_v47, %v1295_v0 }
 0x1c9   : > { %v1384_v18 = vpop.f32.mrf.mxu2 }
 0x1ca   : > { %v1408_v22 = vadd.f32 %v1384_v18, %v1352_v21 }
 0x1cb   : > { %v1495_v57 = vpop.f32.mrf.mxu0 }
 0x1cd   : > { %v1438_v39 = vpop.f32.mrf.mxu3 }
 0x1ce   : > { %v1331_v42 = vpop.f32.mrf.mxu1  ;;  %v1462_v36 = vadd.f32 %v1438_v39, %v1408_v22 }
 0x1cf   : > { %v1353_v56 = vadd.f32 %v1331_v42, %v1296_v31  ;;  %v1146_v42 = vadd.f32 %v2744_v35, %v2727_v23  ;;  %v1149_v23 = vadd.f32 %v2750_v50, %v2731_v20 }
 0x1d0   : > { %v1519_v28 = vadd.f32 %v1495_v57, %v1462_v36 }
 0x1d1   : > { %v1387_v27 = vpop.f32.mrf.mxu2  ;;  %v1245_v57 = vadd.f32 %v2746_v58, %v1146_v42 }
 0x1d2   : > { %v1409_v32 = vadd.f32 %v1387_v27, %v1353_v56 }
 0x1d3   : > { %v1498_v3 = vpop.f32.mrf.mxu0 }
 0x1d5   : > { %v1441_v59 = vpop.f32.mrf.mxu3 }
 0x1d6   : > { %v1334_v51 = vpop.f32.mrf.mxu1  ;;  %v1463_v40 = vadd.f32 %v1441_v59, %v1409_v32 }
 0x1d7   : > { %v1354_v11 = vadd.f32 %v1334_v51, %v1297_v37  ;;  %v1298_v51 = vadd.f32 %v2742_v46, %v1244_v44  ;;  %v1299_v46 = vadd.f32 %v2748_v48, %v1245_v57  ;;  %v1152_v48 = vadd.f32 %v2756_v38, %v2735_v63  ;;  %v1612_v63 = vpop.permute.xlu2 %1611 }
 0x1d8   : > { %v1520_v5 = vadd.f32 %v1498_v3, %v1463_v40  ;;  %v1246_v3 = vadd.f32 %v2752_v52, %v1149_v23 }
 0x1d9   : > { %v1390_v61 = vpop.f32.mrf.mxu2  ;;  %v1247_v37 = vadd.f32 %v2758_v53, %v1152_v48 }
 0x1da   : > { %v1410_v47 = vadd.f32 %v1390_v61, %v1354_v11 }
 0x1db   : > { %v1501_v34 = vpop.f32.mrf.mxu0  ;;  %v1301_v38 = vadd.f32 %v2760_v54, %v1247_v37 }
 0x1dd   : > { %v1444_v30 = vpop.f32.mrf.mxu3 }
 0x1de   : > { %v1337_v12 = vpop.f32.mrf.mxu1  ;;  %v1464_v24 = vadd.f32 %v1444_v30, %v1410_v47  ;;  %v1300_v30 = vadd.f32 %v2754_v29, %v1246_v3  ;;  %v1155_v29 = vadd.f32 %v2762_v55, %v2738_v45 }
 0x1df   : > { %v1355_v39 = vadd.f32 %v1337_v12, %v1298_v51  ;;  %v1608_v12 = vpop.permute.xlu1 %1607  ;;  %v1614_v42 = vpop.permute.xlu2 %1613 }
 0x1e0   : > { %v1521_v59 = vadd.f32 %v1501_v34, %v1464_v24 }
 0x1e1   : > { %v1393_v41 = vpop.f32.mrf.mxu2 }
 0x1e2   : > { %v1411_v21 = vadd.f32 %v1393_v41, %v1355_v39 }
 0x1e3   : > { %v1504_v27 = vpop.f32.mrf.mxu0 }
 0x1e5   : > { %v1447_v4 = vpop.f32.mrf.mxu3 }
 0x1e6   : > { %v2766_v14 = vpop.f32.mrf.mxu1  ;;  %v1465_v16 = vadd.f32 %v1447_v4, %v1411_v21 }
 0x1e7   : > { %v1356_v58 = vadd.f32 %v2766_v14, %v1299_v46 }
 0x1e8   : > { %v1522_v26 = vadd.f32 %v1504_v27, %v1465_v16 }
 0x1e9   : > { %v1396_v60 = vpop.f32.mrf.mxu2 }
 0x1ea   : > { %v1412_v36 = vadd.f32 %v1396_v60, %v1356_v58 }
 0x1eb   : > { %v1507_v56 = vpop.f32.mrf.mxu0 }
 0x1ed   : > { %v1450_v22 = vpop.f32.mrf.mxu3 }
 0x1ee   : > { %v2770_v17 = vpop.f32.mrf.mxu1  ;;  %v1466_v14 = vadd.f32 %v1450_v22, %v1412_v36 }
 0x1f0   : > { %v1523_v40 = vadd.f32 %v1507_v56, %v1466_v14 }
 0x1f1   : > { %v1399_v20 = vpop.f32.mrf.mxu2 }
 0x1f3   : > { %v1510_v34 = vpop.f32.mrf.mxu0 }
 0x1f5   : > { %v1453_v10 = vpop.f32.mrf.mxu3 }
 0x1f6   : > { %v2772_v62 = vpop.f32.mrf.mxu1 }
 0x1f7   : > { %v1358_v44 = vadd.f32 %v2772_v62, %v1301_v38 }
 0x1fb   : > { %v1513_v24 = vpop.f32.mrf.mxu0 }
 0x1fe   : > { %v2774_v8 = vpop.f32.mrf.mxu1 }
 0x203   : > { %v1516_v21 = vpop.f32.mrf.mxu0 }
 0x206   : > { %v1551_v33 = vpop.f32.mrf.mxu1 }
 0x207   : > { %v1575_v2 = vadd.f32 %v1551_v33, %v1519_v28  ;;  %v1357_v28 = vadd.f32 %v2770_v17, %v1300_v30  ;;  %v1610_v33 = vpop.permute.xlu1 %1609 }
 0x209   : > { %v1587_v19 = vadd.f32 %v2780_v1, %v1575_v2 }
 0x20b   : > { %v1627_v49 = vadd.f32 %v1604_v13, %v1587_v19  ;;  %v1413_v13 = vadd.f32 %v1399_v20, %v1357_v28  ;;  %v1402_v19 = vpop.f32.mrf.mxu2 }
 0x20c   : > { %v1414_v4 = vadd.f32 %v1402_v19, %v1358_v44 }
 0x20d   : > { %1635 = vst.msk [vmem:[%s2786_s30] sm:$0xff] %vm285_vm0, %v1627_v49  ;;  %v1467_v41 = vadd.f32 %v1453_v10, %v1413_v13  ;;  %v1248_v49 = vadd.f32 %v2764_v15, %v1155_v29 }
 0x20e   : > { %v1554_v43 = vpop.f32.mrf.mxu1 }
 0x20f   : > { %v1576_v18 = vadd.f32 %v1554_v43, %v1520_v5  ;;  %v1456_v5 = vpop.f32.mrf.mxu3  ;;  %v1524_v43 = vadd.f32 %v1510_v34, %v1467_v41  ;;  %v1302_v54 = vadd.f32 %v2768_v6, %v1248_v49 }
 0x210   : > { %v1468_v51 = vadd.f32 %v1456_v5, %v1414_v4 }
 0x211   : > { %v1588_v7 = vadd.f32 %v2780_v1, %v1576_v18  ;;  %v1359_v62 = vadd.f32 %v2774_v8, %v1302_v54  ;;  %v1616_v8 = vpop.permute.xlu0 %1615 }
 0x213   : > { %v1628_v0 = vadd.f32 %v1606_v25, %v1588_v7  ;;  %v1405_v15 = vpop.f32.mrf.mxu2  ;;  %v1525_v25 = vadd.f32 %v1513_v24, %v1468_v51 }
 0x214   : > { %v1415_v7 = vadd.f32 %v1405_v15, %v1359_v62 }
 0x215   : > { %1636 = vst.msk [vmem:[%s2786_s30 + $0x8] sm:$0xff] %vm285_vm0, %v1628_v0 }
 0x216   : > { %v1557_v9 = vpop.f32.mrf.mxu1 }
 0x217   : > { %v1577_v35 = vadd.f32 %v1557_v9, %v1521_v59  ;;  %v1459_v57 = vpop.f32.mrf.mxu3 }
 0x218   : > { %v1469_v0 = vadd.f32 %v1459_v57, %v1415_v7 }
 0x219   : > { %v1589_v31 = vadd.f32 %v2780_v1, %v1577_v35 }
 0x21a   : > { %v1526_v9 = vadd.f32 %v1516_v21, %v1469_v0 }
 0x21b   : > { %v1629_v61 = vadd.f32 %v1608_v12, %v1589_v31  ;;  %v1618_v12 = vpop.permute.xlu1 %1617 }
 0x21d   : > { %1637 = vst.msk [vmem:[%s2786_s30 + $0x10] sm:$0xff] %vm285_vm0, %v1629_v61 }
 0x21e   : > { %v1560_v50 = vpop.f32.mrf.mxu1 }
 0x21f   : > { %v1578_v32 = vadd.f32 %v1560_v50, %v1522_v26 }
 0x221   : > { %v1590_v52 = vadd.f32 %v2780_v1, %v1578_v32 }
 0x223   : > { %v1630_v2 = vadd.f32 %v1610_v33, %v1590_v52 }
 0x225   : > { %1638 = vst.msk [vmem:[%s2786_s30 + $0x18] sm:$0xff] %vm285_vm0, %v1630_v2 }
 0x226   : > { %v1563_v11 = vpop.f32.mrf.mxu1 }
 0x227   : > { %v1579_v17 = vadd.f32 %v1563_v11, %v1523_v40 }
 0x229   : > { %v1591_v53 = vadd.f32 %v2780_v1, %v1579_v17 }
 0x22b   : > { %v1631_v47 = vadd.f32 %v1612_v63, %v1591_v53 }
 0x22d   : > { %1639 = vst.msk [vmem:[%s2786_s30 + $0x20] sm:$0xff] %vm285_vm0, %v1631_v47 }
 0x22e   : > { %v1566_v45 = vpop.f32.mrf.mxu1 }
 0x22f   : > { %v1580_v55 = vadd.f32 %v1566_v45, %v1524_v43 }
 0x231   : > { %v1592_v18 = vadd.f32 %v2780_v1, %v1580_v55 }
 0x233   : > { %v1632_v39 = vadd.f32 %v1614_v42, %v1592_v18 }
 0x235   : > { %1640 = vst.msk [vmem:[%s2786_s30 + $0x28] sm:$0xff] %vm285_vm0, %v1632_v39 }
 0x236   : > { %v1569_v27 = vpop.f32.mrf.mxu1 }
 0x237   : > { %v1581_v6 = vadd.f32 %v1569_v27, %v1525_v25 }
 0x239   : > { %v1593_v60 = vadd.f32 %v2780_v1, %v1581_v6 }
 0x23b   : > { %v1633_v59 = vadd.f32 %v1616_v8, %v1593_v60 }
 0x23d   : > { %1641 = vst.msk [vmem:[%s2786_s30 + $0x30] sm:$0xff] %vm285_vm0, %v1633_v59 }
 0x23e   : > { %v1572_v23 = vpop.f32.mrf.mxu1 }
 0x23f   : > { %v1582_v46 = vadd.f32 %v1572_v23, %v1526_v9 }
 0x241   : > { %v1594_v35 = vadd.f32 %v2780_v1, %v1582_v46 }
 0x243   : > { %v1634_v22 = vadd.f32 %v1618_v12, %v1594_v35 }
 0x245   : > { %1642 = vst.msk [vmem:[%s2786_s30 + $0x38] sm:$0xff] %vm285_vm0, %v1634_v22 }
 0x246   : > { %2002 = shalt.err (!%p1999_p3)
}
 0x247   : > { %s2041_s17 = smov 128   ;;  %s2042_s26 = smov 8  }
 0x248   : > { %1930 = dma.vmem_to_hbm [thread:$0]  (%p2111_p5), %s1657_s10, 1024, %s1659_s11, %s1644_s22, %s2041_s17, %s2041_s17, %s2042_s26  }
 0x249 PF: > { %p1936_p4 = scmp.ge.s32.totalorder %s2037_s21, 2  ;;  %s1673_s30 = sand.u32 1, %s2025_s18  }
 0x24a   : > { %s1674_s6 = scalar_lea.sflag [#allocation4], %s1673_s30 }
 0x24b   : > { %p1933_p7 = pnand %p1936_p4, %p2115_p6 }
 0x24d   : > { %p1934_p8 = pneg %p1933_p7 }
 0x24f   : > { %2020 = dma.done.wait (%p1934_p8), %s1674_s6, 1024  }
 0x250   : > { %2022 = vsyncadd (%p1934_p8), %s1674_s6, 4294966272  ;;  %p15_p9 = scmp.ge.s32.totalorder %s2098_s24, 4   ;;  %s2874_s18 = smov %s2029_s19 }
 0x251   : > { %s2875_s19 = smov %s2033_s20  ;;  %s2876_s20 = smov %s2109_s27 }
 0x252   : > { %s2877_s21 = smov %s2098_s24  ;;  %17 = sbr.rel (!%p15_p9) target bundleno = 3 (0x3), region = 95 }
 0x257   :  { %1680 = vsyncpa [#allocation4], 1 }
 0x258   :  { %1682 = vsyncpa [#allocation4 + $0x1], 1 }

</bundles_post_ra>
